<compile_context>
chip_gen: v6e
topology: v6e:2x2x1
jax: 0.10.0
libtpu: 0.0.40
codegen_flags: <defaults>
</compile_context>

<pallas_src>
import math

import jax
import jax.numpy as jnp
from jax.experimental import pallas as pl
from jax.experimental.pallas import tpu as pltpu

_LN_EPS = 1e-5


def _round_up(x, m):
    return ((x + m - 1) // m) * m


def _layer_norm(x, gamma, beta):
    """LayerNorm over the last (lane) axis in f32."""
    mu = jnp.mean(x, axis=-1, keepdims=True)
    xc = x - mu
    var = jnp.mean(xc * xc, axis=-1, keepdims=True)
    return xc * jax.lax.rsqrt(var + _LN_EPS) * gamma + beta


# ---------------------------------------------------------------------------
# Pallas kernel 1: fused MSDeformAttn input projections.
#   value          = src @ Wv + bv
#   offsets|attn   = (src + pos) @ Wq + bq     (concat of the two projections)
# ---------------------------------------------------------------------------
def _attn_proj_kernel(src_ref, pos_ref, wv_ref, bv_ref, wq_ref, bq_ref,
                      val_ref, ow_ref):
    src = src_ref[...].astype(jnp.float32)
    q = src + pos_ref[...].astype(jnp.float32)          # with_pos_embed
    val = jnp.dot(src, wv_ref[...], preferred_element_type=jnp.float32) + bv_ref[...]
    ow = jnp.dot(q, wq_ref[...], preferred_element_type=jnp.float32) + bq_ref[...]
    val_ref[...] = val.astype(val_ref.dtype)
    ow_ref[...] = ow.astype(ow_ref.dtype)


def attn_projections(src2d, pos2d, wv, bv, wq, bq, *, tile_m=256):
    M, C = src2d.shape
    Nq = wq.shape[1]
    tm = min(tile_m, _round_up(M, 8))
    M_pad = _round_up(M, tm)
    if M_pad != M:
        pad = ((0, M_pad - M), (0, 0))
        src2d = jnp.pad(src2d, pad)
        pos2d = jnp.pad(pos2d, pad)

    def row(n):
        return pl.BlockSpec((tm, n), lambda i: (i, 0))

    def full(shape):
        return pl.BlockSpec(shape, lambda i: (0, 0))

    val, ow = pl.pallas_call(
        _attn_proj_kernel,
        out_shape=(jax.ShapeDtypeStruct((M_pad, C), src2d.dtype),
                   jax.ShapeDtypeStruct((M_pad, Nq), src2d.dtype)),
        grid_spec=pltpu.PrefetchScalarGridSpec(
            num_scalar_prefetch=0,
            grid=(M_pad // tm,),
            in_specs=[row(C), row(C),
                      full((C, C)), full((1, C)),      # value_proj
                      full((C, Nq)), full((1, Nq))],   # offsets ++ attn weights
            out_specs=[row(C), row(Nq)],
        ),
        compiler_params=pltpu.CompilerParams(
            dimension_semantics=("parallel",)),
    )(src2d, pos2d, wv, bv, wq, bq)
    return val[:M], ow[:M]


# ---------------------------------------------------------------------------
# Pallas kernel 2: everything after the deformable sampling, fully fused.
#   a   = attn_sampled @ Wo + bo            (MSDeformAttn.output_proj)
#   x   = LayerNorm1(src + a)               (dropout1 == identity)
#   h   = relu(x @ W1 + b1)
#   y   = h @ W2 + b2                       (dropout2 == identity)
#   out = LayerNorm2(x + y)                 (dropout3 == identity)
# ---------------------------------------------------------------------------
def _encoder_tail_kernel(src_ref, attn_ref,
                         wo_ref, bo_ref, g1_ref, be1_ref,
                         w1_ref, b1_ref, w2_ref, b2_ref, g2_ref, be2_ref,
                         o_ref):
    src = src_ref[...].astype(jnp.float32)
    attn = attn_ref[...].astype(jnp.float32)
    a = jnp.dot(attn, wo_ref[...], preferred_element_type=jnp.float32) + bo_ref[...]
    x = _layer_norm(src + a, g1_ref[...], be1_ref[...])
    h = jnp.maximum(
        jnp.dot(x, w1_ref[...], preferred_element_type=jnp.float32) + b1_ref[...],
        0.0)
    y = jnp.dot(h, w2_ref[...], preferred_element_type=jnp.float32) + b2_ref[...]
    o_ref[...] = _layer_norm(x + y, g2_ref[...], be2_ref[...]).astype(o_ref.dtype)


def encoder_tail(src2d, attn2d, p, *, tile_m=256):
    M, C = src2d.shape
    Fd = p['linear1_w'].shape[1]
    tm = min(tile_m, _round_up(M, 8))
    M_pad = _round_up(M, tm)
    if M_pad != M:
        pad = ((0, M_pad - M), (0, 0))
        src2d = jnp.pad(src2d, pad)
        attn2d = jnp.pad(attn2d, pad)

    row = pl.BlockSpec((tm, C), lambda i: (i, 0))

    def full(shape):
        return pl.BlockSpec(shape, lambda i: (0, 0))

    out = pl.pallas_call(
        _encoder_tail_kernel,
        out_shape=jax.ShapeDtypeStruct((M_pad, C), src2d.dtype),
        grid_spec=pltpu.PrefetchScalarGridSpec(
            num_scalar_prefetch=0,
            grid=(M_pad // tm,),
            in_specs=[row, row,
                      full((C, C)), full((1, C)),      # output_proj
                      full((1, C)), full((1, C)),      # norm1 gamma / beta
                      full((C, Fd)), full((1, Fd)),    # linear1
                      full((Fd, C)), full((1, C)),     # linear2
                      full((1, C)), full((1, C))],     # norm2 gamma / beta
            out_specs=pl.BlockSpec((tm, C), lambda i: (i, 0)),
        ),
        compiler_params=pltpu.CompilerParams(
            dimension_semantics=("parallel",)),
    )(src2d, attn2d,
      p['output_proj_w'], p['output_proj_b'],
      p['norm1_g'], p['norm1_b'],
      p['linear1_w'], p['linear1_b'],
      p['linear2_w'], p['linear2_b'],
      p['norm2_g'], p['norm2_b'])
    return out[:M]


# ---------------------------------------------------------------------------
# MSDeformAttn core: multi-scale bilinear sampling (F.grid_sample equivalent,
# bilinear, padding_mode='zeros', align_corners=False).
# ---------------------------------------------------------------------------
def _ms_deform_attn_core(value, spatial_shapes_list, sampling_locations,
                         attention_weights):
    B, _, H, Dh = value.shape
    _, Lq, _, L, P, _ = sampling_locations.shape
    out = jnp.zeros((B, Lq, H, Dh), jnp.float32)
    start = 0
    for lid, (Hs, Ws) in enumerate(spatial_shapes_list):
        v = value[:, start:start + Hs * Ws]            # [B, Hs*Ws, H, Dh]
        start += Hs * Ws
        v = jnp.transpose(v, (0, 2, 1, 3))             # [B, H, Hs*Ws, Dh]

        loc = sampling_locations[:, :, :, lid]         # [B, Lq, H, P, 2]
        x = loc[..., 0] * Ws - 0.5                     # align_corners=False
        y = loc[..., 1] * Hs - 0.5
        x0 = jnp.floor(x)
        y0 = jnp.floor(y)
        wx1 = x - x0
        wy1 = y - y0

        def corner(ix, iy, w):
            valid = (ix >= 0) & (ix <= Ws - 1) & (iy >= 0) & (iy <= Hs - 1)
            ixc = jnp.clip(ix, 0, Ws - 1).astype(jnp.int32)
            iyc = jnp.clip(iy, 0, Hs - 1).astype(jnp.int32)
            flat = iyc * Ws + ixc                                  # [B,Lq,H,P]
            flat = jnp.transpose(flat, (0, 2, 1, 3)).reshape(B, H, Lq * P)
            g = jnp.take_along_axis(v, flat[..., None], axis=2)    # [B,H,Lq*P,Dh]
            g = g.reshape(B, H, Lq, P, Dh)
            wz = jnp.where(valid, w, 0.0)                          # zero padding
            wz = jnp.transpose(wz, (0, 2, 1, 3))                   # [B,H,Lq,P]
            return g * wz[..., None]

        samp = (corner(x0, y0, (1.0 - wx1) * (1.0 - wy1))
                + corner(x0 + 1.0, y0, wx1 * (1.0 - wy1))
                + corner(x0, y0 + 1.0, (1.0 - wx1) * wy1)
                + corner(x0 + 1.0, y0 + 1.0, wx1 * wy1))           # [B,H,Lq,P,Dh]

        aw = jnp.transpose(attention_weights[:, :, :, lid], (0, 2, 1, 3))
        lvl = (samp * aw[..., None]).sum(axis=3)                   # [B,H,Lq,Dh]
        out = out + jnp.transpose(lvl, (0, 2, 1, 3))
    return out.reshape(B, Lq, H * Dh)


# ---------------------------------------------------------------------------
# Full encoder-layer forward (inference mode; dropout == identity).
# ---------------------------------------------------------------------------
def deformable_encoder_layer_forward(p, src, pos, reference_points,
                                     spatial_shapes_list,
                                     level_start_index=None, padding_mask=None,
                                     *, n_heads=8, n_levels=4, n_points=4,
                                     tile_m=256):
    del level_start_index  # level layout taken from the static spatial_shapes_list
    B, Len, C = src.shape
    H, L, P = n_heads, n_levels, n_points
    Dh = C // H
    M = B * Len

    src2d = src.reshape(M, C)
    pos2d = pos.reshape(M, C)

    # --- fused projections (value_proj + sampling_offsets/attention_weights) ---
    value2d, ow2d = attn_projections(
        src2d, pos2d, p['value_proj_w'], p['value_proj_b'],
        p['qproj_w'], p['qproj_b'], tile_m=tile_m)

    value = value2d.reshape(B, Len, H, Dh)
    if padding_mask is not None:
        value = jnp.where(padding_mask[:, :, None, None], 0.0, value)

    off_dim = H * L * P * 2
    ow = ow2d.reshape(B, Len, -1)
    sampling_offsets = ow[..., :off_dim].reshape(B, Len, H, L, P, 2)
    attention_weights = jax.nn.softmax(
        ow[..., off_dim:].reshape(B, Len, H, L * P), axis=-1
    ).reshape(B, Len, H, L, P)

    offset_normalizer = jnp.array([[w, h] for (h, w) in spatial_shapes_list],
                                  jnp.float32)
    sampling_locations = (reference_points[:, :, None, :, None, :]
                          + sampling_offsets
                          / offset_normalizer[None, None, None, :, None, :])

    # TODO(synk): the grid_sample-style data-dependent bilinear gather has no clean
    # Pallas equivalent (would need a scalar-prefetch DMA-gather kernel); done in JAX.
    attn2d = _ms_deform_attn_core(value, spatial_shapes_list, sampling_locations,
                                  attention_weights).reshape(M, C)

    # --- fused output_proj + residual + LN1 + FFN + residual + LN2 ---
    # TODO(synk): dropout layers are treated as identity (inference mode only).
    out2d = encoder_tail(src2d, attn2d, p, tile_m=tile_m)
    return out2d.reshape(B, Len, C)


# ---------------------------------------------------------------------------
# Parameter init (deterministic, torch-Linear-like). Weights stored as [in, out]
# (= torch weight.T), biases as [1, out]. sampling_offsets and attention_weights
# projections are concatenated so both come from one lane-dense matmul.
# ---------------------------------------------------------------------------
def init_params(key, d_model, d_ffn, n_heads, n_levels, n_points,
                dtype=jnp.float32):
    def linear(k, n_in, n_out):
        kw, kb = jax.random.split(k)
        bound = 1.0 / math.sqrt(n_in)
        w = jax.random.uniform(kw, (n_in, n_out), dtype, -bound, bound)
        b = jax.random.uniform(kb, (1, n_out), dtype, -bound, bound)
        return w, b

    ks = jax.random.split(key, 7)
    qdim = n_heads * n_levels * n_points * 3   # 2 offset coords + 1 weight logit
    p = {}
    p['value_proj_w'], p['value_proj_b'] = linear(ks[0], d_model, d_model)
    p['qproj_w'], p['qproj_b'] = linear(ks[1], d_model, qdim)
    p['output_proj_w'], p['output_proj_b'] = linear(ks[2], d_model, d_model)
    p['linear1_w'], p['linear1_b'] = linear(ks[3], d_model, d_ffn)
    p['linear2_w'], p['linear2_b'] = linear(ks[4], d_ffn, d_model)
    for i, name in enumerate(('norm1', 'norm2')):
        kg, kb = jax.random.split(ks[5 + i])
        p[f'{name}_g'] = 1.0 + 0.1 * jax.random.normal(kg, (1, d_model), dtype)
        p[f'{name}_b'] = 0.1 * jax.random.normal(kb, (1, d_model), dtype)
    return p


# ---------------------------------------------------------------------------
# Pure-JAX reference of the same forward (no Pallas) for correctness checking.
# ---------------------------------------------------------------------------
def reference_forward(p, src, pos, reference_points, spatial_shapes_list,
                      n_heads, n_levels, n_points, padding_mask=None):
    B, Len, C = src.shape
    H, L, P = n_heads, n_levels, n_points
    Dh = C // H

    value = src @ p['value_proj_w'] + p['value_proj_b']
    if padding_mask is not None:
        value = jnp.where(padding_mask[..., None], 0.0, value)
    value = value.reshape(B, Len, H, Dh)

    ow = (src + pos) @ p['qproj_w'] + p['qproj_b']
    off_dim = H * L * P * 2
    sampling_offsets = ow[..., :off_dim].reshape(B, Len, H, L, P, 2)
    attention_weights = jax.nn.softmax(
        ow[..., off_dim:].reshape(B, Len, H, L * P), axis=-1
    ).reshape(B, Len, H, L, P)

    offset_normalizer = jnp.array([[w, h] for (h, w) in spatial_shapes_list],
                                  jnp.float32)
    sampling_locations = (reference_points[:, :, None, :, None, :]
                          + sampling_offsets
                          / offset_normalizer[None, None, None, :, None, :])
    attn = _ms_deform_attn_core(value, spatial_shapes_list, sampling_locations,
                                attention_weights)
    attn = attn @ p['output_proj_w'] + p['output_proj_b']

    def ln(x, g, b):
        mu = x.mean(-1, keepdims=True)
        var = ((x - mu) ** 2).mean(-1, keepdims=True)
        return (x - mu) / jnp.sqrt(var + _LN_EPS) * g + b

    x = ln(src + attn, p['norm1_g'], p['norm1_b'])
    h = jnp.maximum(x @ p['linear1_w'] + p['linear1_b'], 0.0)
    y = h @ p['linear2_w'] + p['linear2_b']
    return ln(x + y, p['norm2_g'], p['norm2_b'])


if __name__ == "__main__":
    # Small shapes consistent with the module defaults.
    d_model, d_ffn = 256, 1024
    n_heads, n_levels, n_points = 8, 4, 4
    spatial_shapes_list = [(8, 8), (4, 4), (2, 2), (1, 1)]     # multi-scale maps
    batch = 2
    seq = sum(h * w for h, w in spatial_shapes_list)           # 85 tokens

    key = jax.random.PRNGKey(0)
    k_src, k_pos, k_ref, k_par = jax.random.split(key, 4)
    src = jax.random.normal(k_src, (batch, seq, d_model), jnp.float32)
    pos = jax.random.normal(k_pos, (batch, seq, d_model), jnp.float32)
    reference_points = jax.random.uniform(
        k_ref, (batch, seq, n_levels, 2), jnp.float32)
    params = init_params(k_par, d_model, d_ffn, n_heads, n_levels, n_points)

    spatial_shapes = jnp.array(spatial_shapes_list, jnp.int32)
    level_start_index = jnp.concatenate(
        [jnp.zeros((1,), jnp.int32),
         jnp.cumsum(spatial_shapes.prod(-1))[:-1].astype(jnp.int32)])

    out = deformable_encoder_layer_forward(
        params, src, pos, reference_points, spatial_shapes_list,
        level_start_index=level_start_index, padding_mask=None,
        n_heads=n_heads, n_levels=n_levels, n_points=n_points, tile_m=256)
    out = jax.block_until_ready(out)

    ref = reference_forward(params, src, pos, reference_points,
                            spatial_shapes_list, n_heads, n_levels, n_points)
    ref = jax.block_until_ready(ref)

    assert out.shape == (batch, seq, d_model)
    max_diff = float(jnp.max(jnp.abs(out - ref)))
    # Tolerance covers the difference between the Pallas MXU f32 path and XLA's
    # default (possibly reduced-precision) f32 matmul path used by the reference.
    assert max_diff < 2e-2, f"max |kernel - reference| = {max_diff}"

    print("KERNEL_OK")
</pallas_src>

<mosaic_0001>
module attributes {stable_mosaic.version = 11 : i64} {
  func.func @_attn_proj_kernel(%arg0: i32, %arg1: memref<176x256xf32, #tpu.memory_space<vmem>>, %arg2: memref<176x256xf32, #tpu.memory_space<vmem>>, %arg3: memref<256x256xf32, #tpu.memory_space<vmem>>, %arg4: memref<1x256xf32, #tpu.memory_space<vmem>>, %arg5: memref<256x384xf32, #tpu.memory_space<vmem>>, %arg6: memref<1x384xf32, #tpu.memory_space<vmem>>, %arg7: memref<176x256xf32, #tpu.memory_space<vmem>>, %arg8: memref<176x384xf32, #tpu.memory_space<vmem>>) attributes {dimension_semantics = [#tpu.dimension_semantics<parallel>], iteration_bounds = array<i64: 1>, scalar_prefetch = 0 : i64, scratch_operands = 0 : i64, tpu.core_type = #tpu.core_type<tc>, window_params = [{transform_indices = @transform_0, window_bounds = array<i64: 176, 256>}, {transform_indices = @transform_1, window_bounds = array<i64: 176, 256>}, {pipeline_mode = #tpu.pipeline_mode<synchronous>, transform_indices = @transform_2, window_bounds = array<i64: 256, 256>}, {pipeline_mode = #tpu.pipeline_mode<synchronous>, transform_indices = @transform_3, window_bounds = array<i64: 1, 256>}, {pipeline_mode = #tpu.pipeline_mode<synchronous>, transform_indices = @transform_4, window_bounds = array<i64: 256, 384>}, {pipeline_mode = #tpu.pipeline_mode<synchronous>, transform_indices = @transform_5, window_bounds = array<i64: 1, 384>}, {transform_indices = @transform_6, window_bounds = array<i64: 176, 256>}, {transform_indices = @transform_7, window_bounds = array<i64: 176, 384>}]} {
    %c0 = arith.constant 0 : index
    %c0_0 = arith.constant 0 : index
    %0 = vector.load %arg1[%c0, %c0_0] : memref<176x256xf32, #tpu.memory_space<vmem>>, vector<176x256xf32>
    %c0_1 = arith.constant 0 : index
    %c0_2 = arith.constant 0 : index
    %1 = vector.load %arg2[%c0_1, %c0_2] : memref<176x256xf32, #tpu.memory_space<vmem>>, vector<176x256xf32>
    %2 = arith.addf %0, %1 : vector<176x256xf32>
    %c0_3 = arith.constant 0 : index
    %c0_4 = arith.constant 0 : index
    %3 = vector.load %arg3[%c0_3, %c0_4] : memref<256x256xf32, #tpu.memory_space<vmem>>, vector<256x256xf32>
    %cst = arith.constant dense<0.000000e+00> : vector<176x256xf32>
    %4 = tpu.matmul %0, %3, %cst {dimension_numbers = #tpu.dot_dimension_numbers<[1], [0], [0], [1], [0, 0, 1, 1], [], []>} : vector<176x256xf32>, vector<256x256xf32>, vector<176x256xf32> -> vector<176x256xf32>
    %c0_5 = arith.constant 0 : index
    %c0_6 = arith.constant 0 : index
    %5 = vector.load %arg4[%c0_5, %c0_6] : memref<1x256xf32, #tpu.memory_space<vmem>>, vector<1x256xf32>
    %6 = vector.broadcast %5 : vector<1x256xf32> to vector<176x256xf32>
    %7 = arith.addf %4, %6 : vector<176x256xf32>
    %c0_7 = arith.constant 0 : index
    %c0_8 = arith.constant 0 : index
    %8 = vector.load %arg5[%c0_7, %c0_8] : memref<256x384xf32, #tpu.memory_space<vmem>>, vector<256x384xf32>
    %cst_9 = arith.constant dense<0.000000e+00> : vector<176x384xf32>
    %9 = tpu.matmul %2, %8, %cst_9 {dimension_numbers = #tpu.dot_dimension_numbers<[1], [0], [0], [1], [0, 0, 1, 1], [], []>} : vector<176x256xf32>, vector<256x384xf32>, vector<176x384xf32> -> vector<176x384xf32>
    %c0_10 = arith.constant 0 : index
    %c0_11 = arith.constant 0 : index
    %10 = vector.load %arg6[%c0_10, %c0_11] : memref<1x384xf32, #tpu.memory_space<vmem>>, vector<1x384xf32>
    %11 = vector.broadcast %10 : vector<1x384xf32> to vector<176x384xf32>
    %12 = arith.addf %9, %11 : vector<176x384xf32>
    %c0_12 = arith.constant 0 : index
    %c0_13 = arith.constant 0 : index
    %13 = vector.load %arg7[%c0_12, %c0_13] : memref<176x256xf32, #tpu.memory_space<vmem>>, vector<176x256xf32>
    tpu.vector_store %arg7[%c0_12, %c0_13], %7 {strides = array<i32>} : memref<176x256xf32, #tpu.memory_space<vmem>>, vector<176x256xf32>,
    %c0_14 = arith.constant 0 : index
    %c0_15 = arith.constant 0 : index
    %14 = vector.load %arg8[%c0_14, %c0_15] : memref<176x384xf32, #tpu.memory_space<vmem>>, vector<176x384xf32>
    tpu.vector_store %arg8[%c0_14, %c0_15], %12 {strides = array<i32>} : memref<176x384xf32, #tpu.memory_space<vmem>>, vector<176x384xf32>,
    return
  }
  func.func @transform_0(%arg0: i32) -> (i32, i32) {
    %c0_i32 = arith.constant 0 : i32
    %c0_i32_0 = arith.constant 0 : i32
    return %arg0, %c0_i32 : i32, i32
  }
  func.func @transform_1(%arg0: i32) -> (i32, i32) {
    %c0_i32 = arith.constant 0 : i32
    %c0_i32_0 = arith.constant 0 : i32
    return %arg0, %c0_i32 : i32, i32
  }
  func.func @transform_2(%arg0: i32) -> (i32, i32) {
    %c0_i32 = arith.constant 0 : i32
    %c0_i32_0 = arith.constant 0 : i32
    %c0_i32_1 = arith.constant 0 : i32
    return %c0_i32, %c0_i32_0 : i32, i32
  }
  func.func @transform_3(%arg0: i32) -> (i32, i32) {
    %c0_i32 = arith.constant 0 : i32
    %c0_i32_0 = arith.constant 0 : i32
    %c0_i32_1 = arith.constant 0 : i32
    return %c0_i32, %c0_i32_0 : i32, i32
  }
  func.func @transform_4(%arg0: i32) -> (i32, i32) {
    %c0_i32 = arith.constant 0 : i32
    %c0_i32_0 = arith.constant 0 : i32
    %c0_i32_1 = arith.constant 0 : i32
    return %c0_i32, %c0_i32_0 : i32, i32
  }
  func.func @transform_5(%arg0: i32) -> (i32, i32) {
    %c0_i32 = arith.constant 0 : i32
    %c0_i32_0 = arith.constant 0 : i32
    %c0_i32_1 = arith.constant 0 : i32
    return %c0_i32, %c0_i32_0 : i32, i32
  }
  func.func @transform_6(%arg0: i32) -> (i32, i32) {
    %c0_i32 = arith.constant 0 : i32
    %c0_i32_0 = arith.constant 0 : i32
    return %arg0, %c0_i32 : i32, i32
  }
  func.func @transform_7(%arg0: i32) -> (i32, i32) {
    %c0_i32 = arith.constant 0 : i32
    %c0_i32_0 = arith.constant 0 : i32
    return %arg0, %c0_i32 : i32, i32
  }
}

</mosaic_0001>

<bundles_post_ra>
// kernel: tpu_custom_call.1
= control target key start
LH: loop header
LB: loop body
LE: loop exit
PB: predicated region body
PF: predicated region fallthrough
CT: control target
= control target key end

     0   :  { %13 = vsyncpa [#allocation3], 0  ;;  %s1777_s0 = inlined_call_operand.hbm [shape: f32[176,256], index: 0, kind: input, shape index: {}]   ;;  %s1778_s1 = inlined_call_operand.hbm [shape: f32[176,256], index: 1, kind: input, shape index: {}]   ;;  %s1779_s2 = inlined_call_operand.hbm [shape: f32[256,256], index: 2, kind: input, shape index: {}]   ;;  %s1780_s3 = inlined_call_operand.vmem [shape: f32[1,256], index: 3, kind: input, shape index: {}]   ;;  %s1781_s4 = inlined_call_operand.hbm [shape: f32[256,384], index: 4, kind: input, shape index: {}]   ;;  %s1782_s5 = inlined_call_operand.vmem [shape: f32[1,384], index: 5, kind: input, shape index: {}]   ;;  %s1783_s6 = inlined_call_operand.hbm [shape: f32[176,256], index: 6, kind: output, shape index: {0}]   ;;  %s1784_s7 = inlined_call_operand.hbm [shape: f32[176,384], index: 7, kind: output, shape index: {1}]  }
   0x1   :  { %14 = vsyncpa [#allocation6], 0 }
   0x2   :  { %15 = vsyncpa [#allocation9], 0 }
   0x3   :  { %16 = vsyncpa [#allocation4], 0 }
   0x4   :  { %17 = vsyncpa [#allocation12], 0  ;;  %s1322_s24 = smov [#allocation5]   ;;  %s1323_s26 = smov [#allocation2]  }
   0x5   :  { %s35_s25 = sshll.u32 %s1322_s24, 4  ;;  %s23_s27 = sshll.u32 %s1323_s26, 4  ;;  %s36_s25 = int_to_ptr.vmem [resolvable:$true] %s35_s25  ;;  %s24_s27 = int_to_ptr.vmem [resolvable:$true] %s23_s27 }
   0x6   :  { %s1200_s28 = scalar_lea.vmem %s36_s25, 5632  ;;  %p1205_p1 = scmp.lt.s32.totalorder %s36_s25, %s36_s25 }
   0x7   :  { %p1201_p0 = scmp.ne.s32.totalorder %s36_s25, %s1200_s28  ;;  %p1206_p2 = scmp.lt.s32.totalorder %s1200_s28, %s1200_s28 }
   0x9   :  { %p1207_p3 = por %p1206_p2, %p1205_p1 }
   0xb   :  { %p1208_p4 = pnand %p1207_p3, %p1201_p0 }
   0xd   :  { %1211 = shalt.err (!%p1208_p4)
}
   0xe   :  { %s1324_s29 = smov 256   ;;  %s1325_s30 = smov 16  }
   0xf   :  { %41 = dma.hbm_to_vmem [thread:$0]  %s1778_s1, 5632, %s36_s25, [#allocation6], %s1324_s29, %s1324_s29, %s1325_s30  }
  0x10   :  { %s1220_s10 = scalar_lea.vmem %s24_s27, 5632  ;;  %p1225_p6 = scmp.lt.s32.totalorder %s24_s27, %s24_s27 }
  0x11   :  { %p1221_p5 = scmp.ne.s32.totalorder %s24_s27, %s1220_s10  ;;  %p1226_p7 = scmp.lt.s32.totalorder %s1220_s10, %s1220_s10 }
  0x13   :  { %p1227_p8 = por %p1226_p7, %p1225_p6 }
  0x15   :  { %p1228_p9 = pnand %p1227_p8, %p1221_p5 }
  0x17   :  { %1231 = shalt.err (!%p1228_p9)
}
  0x18   :  { %29 = dma.hbm_to_vmem [thread:$0]  %s1777_s0, 5632, %s24_s27, [#allocation3], %s1324_s29, %s1324_s29, %s1325_s30  }
  0x19   :  { %s1326_s13 = smov [#allocation7]   ;;  %s1327_s15 = smov [#allocation8]  }
  0x1a   :  { %s47_s14 = sshll.u32 %s1326_s13, 4  ;;  %s61_s16 = sshll.u32 %s1327_s15, 4  ;;  %s48_s14 = int_to_ptr.vmem [resolvable:$true] %s47_s14  ;;  %s62_s16 = int_to_ptr.vmem [resolvable:$true] %s61_s16 }
  0x1b   :  { %s1240_s1 = scalar_lea.vmem %s48_s14, 8192  ;;  %p1245_p11 = scmp.lt.s32.totalorder %s48_s14, %s48_s14 }
  0x1c   :  { %p1241_p10 = scmp.ne.s32.totalorder %s48_s14, %s1240_s1  ;;  %p1246_p12 = scmp.lt.s32.totalorder %s1240_s1, %s1240_s1 }
  0x1e   :  { %p1247_p13 = por %p1246_p12, %p1245_p11 }
  0x20   :  { %p1248_p0 = pnand %p1247_p13, %p1241_p10 }
  0x22   :  { %1251 = shalt.err (!%p1248_p0)
}
  0x23   :  { %53 = dma.hbm_to_vmem [thread:$0]  %s1779_s2, 8192, %s48_s14, [#allocation6], %s1324_s29, %s1324_s29, %s1325_s30  }
  0x24   :  { %s1260_s0 = scalar_lea.vmem %s62_s16, 12288  ;;  %p1265_p2 = scmp.lt.s32.totalorder %s62_s16, %s62_s16 }
  0x25   :  { %p1261_p1 = scmp.ne.s32.totalorder %s62_s16, %s1260_s0  ;;  %p1266_p3 = scmp.lt.s32.totalorder %s1260_s0, %s1260_s0 }
  0x27   :  { %p1267_p4 = por %p1266_p3, %p1265_p2 }
  0x29   :  { %p1268_p5 = pnand %p1267_p4, %p1261_p1 }
  0x2b   :  { %1271 = shalt.err (!%p1268_p5)
}
  0x2c   :  { %s1328_s19 = smov 384   ;;  %s1329_s20 = smov 24  }
  0x2d   :  { %67 = dma.hbm_to_vmem [thread:$0]  %s1781_s4, 12288, %s62_s16, [#allocation9], %s1328_s19, %s1328_s19, %s1329_s20  }
  0x2e   :  { %1312 = dma.done.wait [#allocation3], 5632  }
  0x2f   :  { %1313 = vsyncadd [#allocation3], 4294961664 }
  0x30   :  { %1314 = dma.done.wait [#allocation6], 13824  }
  0x31   :  { %1315 = vsyncadd [#allocation6], 4294953472 }
  0x32   :  { %1316 = dma.done.wait [#allocation9], 12288  }
  0x33   :  { %1317 = vsyncadd [#allocation9], 4294955008  ;;  %v245_v0 = vld [vmem:[#allocation7 + $0xf8] sm:$0xff]  ;;  %v533_v1 = vld [vmem:[#allocation8 + $0x170] sm:$0xff] }
  0x34   :  { %v244_v2 = vld [vmem:[#allocation7 + $0xf0] sm:$0xff]  ;;  %290 = vmatprep.subr.mxu0 %v245_v0  ;;  %600 = vmatprep.subr.mxu1 %v533_v1  ;;  %v532_v3 = vld [vmem:[#allocation8 + $0x168] sm:$0xff]  ;;  %v530_v5 = vld [vmem:[#allocation8 + $0x158] sm:$0xff] }
  0x35   :  { %v243_v4 = vld [vmem:[#allocation7 + $0xe8] sm:$0xff]  ;;  %291 = vmatpush1.msra.mxu0 %v244_v2  ;;  %601 = vmatpush1.msra.mxu1 %v532_v3  ;;  %v242_v6 = vld [vmem:[#allocation7 + $0xe0] sm:$0xff]  ;;  %v529_v7 = vld [vmem:[#allocation8 + $0x150] sm:$0xff] }
  0x36   :  { %v241_v8 = vld [vmem:[#allocation7 + $0xd8] sm:$0xff]  ;;  %292 = vmatprep.subr.mxu0 %v243_v4  ;;  %602 = vmatprep.subr.mxu1 %v530_v5  ;;  %v527_v9 = vld [vmem:[#allocation8 + $0x140] sm:$0xff]  ;;  %v240_v10 = vld [vmem:[#allocation7 + $0xd0] sm:$0xff] }
  0x37   :  { %v526_v11 = vld [vmem:[#allocation8 + $0x138] sm:$0xff]  ;;  %293 = vmatpush1.msra.mxu0 %v242_v6  ;;  %603 = vmatpush1.msra.mxu1 %v529_v7  ;;  %v239_v12 = vld [vmem:[#allocation7 + $0xc8] sm:$0xff]  ;;  %v238_v14 = vld [vmem:[#allocation7 + $0xc0] sm:$0xff] }
  0x38   :  { %v524_v13 = vld [vmem:[#allocation8 + $0x128] sm:$0xff]  ;;  %294 = vmatprep.subr.mxu0 %v241_v8  ;;  %604 = vmatprep.subr.mxu1 %v527_v9  ;;  %v523_v15 = vld [vmem:[#allocation8 + $0x120] sm:$0xff]  ;;  %v237_v16 = vld [vmem:[#allocation7 + $0xb8] sm:$0xff] }
  0x39   :  { %295 = vmatpush1.msra.mxu0 %v240_v10  ;;  %605 = vmatpush1.msra.mxu1 %v526_v11  ;;  %v521_v17 = vld [vmem:[#allocation8 + $0x110] sm:$0xff]  ;;  %v520_v19 = vld [vmem:[#allocation8 + $0x108] sm:$0xff]  ;;  %v518_v21 = vld [vmem:[#allocation8 + $0xf8] sm:$0xff] }
  0x3a   :  { %296 = vmatprep.subr.mxu0 %v239_v12  ;;  %606 = vmatprep.subr.mxu1 %v524_v13  ;;  %v236_v18 = vld [vmem:[#allocation7 + $0xb0] sm:$0xff]  ;;  %v235_v20 = vld [vmem:[#allocation7 + $0xa8] sm:$0xff]  ;;  %v234_v22 = vld [vmem:[#allocation7 + $0xa0] sm:$0xff] }
  0x3b   :  { %297 = vmatpush1.msra.mxu0 %v238_v14  ;;  %607 = vmatpush1.msra.mxu1 %v523_v15  ;;  %v517_v23 = vld [vmem:[#allocation8 + $0xf0] sm:$0xff]  ;;  %v233_v24 = vld [vmem:[#allocation7 + $0x98] sm:$0xff]  ;;  %v515_v25 = vld [vmem:[#allocation8 + $0xe0] sm:$0xff] }
  0x3c   :  { %298 = vmatprep.subr.mxu0 %v237_v16  ;;  %608 = vmatprep.subr.mxu1 %v521_v17  ;;  %v232_v26 = vld [vmem:[#allocation7 + $0x90] sm:$0xff]  ;;  %v514_v27 = vld [vmem:[#allocation8 + $0xd8] sm:$0xff]  ;;  %v231_v28 = vld [vmem:[#allocation7 + $0x88] sm:$0xff] }
  0x3d   :  { %299 = vmatpush1.msra.mxu0 %v236_v18  ;;  %609 = vmatpush1.msra.mxu1 %v520_v19  ;;  %v512_v29 = vld [vmem:[#allocation8 + $0xc8] sm:$0xff]  ;;  %v230_v30 = vld [vmem:[#allocation7 + $0x80] sm:$0xff]  ;;  %v229_v32 = vld [vmem:[#allocation7 + $0x78] sm:$0xff] }
  0x3e   :  { %300 = vmatprep.subr.mxu0 %v235_v20  ;;  %610 = vmatprep.subr.mxu1 %v518_v21  ;;  %v511_v31 = vld [vmem:[#allocation8 + $0xc0] sm:$0xff]  ;;  %v509_v33 = vld [vmem:[#allocation8 + $0xb0] sm:$0xff]  ;;  %v508_v35 = vld [vmem:[#allocation8 + $0xa8] sm:$0xff] }
  0x3f   :  { %301 = vmatpush1.msra.mxu0 %v234_v22  ;;  %611 = vmatpush1.msra.mxu1 %v517_v23  ;;  %v228_v34 = vld [vmem:[#allocation7 + $0x70] sm:$0xff]  ;;  %v227_v36 = vld [vmem:[#allocation7 + $0x68] sm:$0xff]  ;;  %v506_v37 = vld [vmem:[#allocation8 + $0x98] sm:$0xff] }
  0x40   :  { %302 = vmatprep.subr.mxu0 %v233_v24  ;;  %612 = vmatprep.subr.mxu1 %v515_v25  ;;  %v226_v38 = vld [vmem:[#allocation7 + $0x60] sm:$0xff]  ;;  %v505_v39 = vld [vmem:[#allocation8 + $0x90] sm:$0xff]  ;;  %v225_v40 = vld [vmem:[#allocation7 + $0x58] sm:$0xff] }
  0x41   :  { %303 = vmatpush1.msra.mxu0 %v232_v26  ;;  %613 = vmatpush1.msra.mxu1 %v514_v27  ;;  %v503_v41 = vld [vmem:[#allocation8 + $0x80] sm:$0xff]  ;;  %v224_v42 = vld [vmem:[#allocation7 + $0x50] sm:$0xff]  ;;  %v502_v43 = vld [vmem:[#allocation8 + $0x78] sm:$0xff] }
  0x42   :  { %304 = vmatprep.subr.mxu0 %v231_v28  ;;  %614 = vmatprep.subr.mxu1 %v512_v29  ;;  %v223_v44 = vld [vmem:[#allocation7 + $0x48] sm:$0xff]  ;;  %v222_v46 = vld [vmem:[#allocation7 + $0x40] sm:$0xff]  ;;  %v221_v48 = vld [vmem:[#allocation7 + $0x38] sm:$0xff] }
  0x43   :  { %305 = vmatpush1.msra.mxu0 %v230_v30  ;;  %615 = vmatpush1.msra.mxu1 %v511_v31  ;;  %v500_v45 = vld [vmem:[#allocation8 + $0x68] sm:$0xff]  ;;  %v499_v47 = vld [vmem:[#allocation8 + $0x60] sm:$0xff]  ;;  %v497_v49 = vld [vmem:[#allocation8 + $0x50] sm:$0xff] }
  0x44   :  { %306 = vmatprep.subr.mxu0 %v229_v32  ;;  %616 = vmatprep.subr.mxu1 %v509_v33  ;;  %v220_v50 = vld [vmem:[#allocation7 + $0x30] sm:$0xff]  ;;  %v496_v51 = vld [vmem:[#allocation8 + $0x48] sm:$0xff]  ;;  %v494_v53 = vld [vmem:[#allocation8 + $0x38] sm:$0xff] }
  0x45   :  { %307 = vmatpush1.msra.mxu0 %v228_v34  ;;  %617 = vmatpush1.msra.mxu1 %v508_v35  ;;  %v219_v52 = vld [vmem:[#allocation7 + $0x28] sm:$0xff]  ;;  %v218_v54 = vld [vmem:[#allocation7 + $0x20] sm:$0xff]  ;;  %v493_v55 = vld [vmem:[#allocation8 + $0x30] sm:$0xff] }
  0x46   :  { %308 = vmatprep.subr.mxu0 %v227_v36  ;;  %618 = vmatprep.subr.mxu1 %v506_v37  ;;  %v217_v56 = vld [vmem:[#allocation7 + $0x18] sm:$0xff]  ;;  %v491_v57 = vld [vmem:[#allocation8 + $0x20] sm:$0xff]  ;;  %v216_v58 = vld [vmem:[#allocation7 + $0x10] sm:$0xff] }
  0x47   :  { %309 = vmatpush1.msra.mxu0 %v226_v38  ;;  %619 = vmatpush1.msra.mxu1 %v505_v39  ;;  %v490_v59 = vld [vmem:[#allocation8 + $0x18] sm:$0xff]  ;;  %v215_v60 = vld [vmem:[#allocation7 + $0x8] sm:$0xff]  ;;  %v214_v62 = vld [vmem:[#allocation7] sm:$0xff] }
  0x48   :  { %310 = vmatprep.subr.mxu0 %v225_v40  ;;  %620 = vmatprep.subr.mxu1 %v503_v41  ;;  %v488_v61 = vld [vmem:[#allocation8 + $0x8] sm:$0xff]  ;;  %v487_v63 = vld [vmem:[#allocation8] sm:$0xff]  ;;  %v277_v0 = vld [vmem:[#allocation7 + $0x1f8] sm:$0xff] }
  0x49   :  { %311 = vmatpush1.msra.mxu0 %v224_v42  ;;  %621 = vmatpush1.msra.mxu1 %v502_v43  ;;  %v581_v1 = vld [vmem:[#allocation8 + $0x2f0] sm:$0xff]  ;;  %v580_v3 = vld [vmem:[#allocation8 + $0x2e8] sm:$0xff]  ;;  %v578_v5 = vld [vmem:[#allocation8 + $0x2d8] sm:$0xff] }
  0x4a   :  { %312 = vmatprep.subr.mxu0 %v223_v44  ;;  %622 = vmatprep.subr.mxu1 %v500_v45  ;;  %v276_v2 = vld [vmem:[#allocation7 + $0x1f0] sm:$0xff]  ;;  %v275_v4 = vld [vmem:[#allocation7 + $0x1e8] sm:$0xff]  ;;  %v274_v6 = vld [vmem:[#allocation7 + $0x1e0] sm:$0xff] }
  0x4b   :  { %313 = vmatpush1.msra.mxu0 %v222_v46  ;;  %623 = vmatpush1.msra.mxu1 %v499_v47  ;;  %v577_v7 = vld [vmem:[#allocation8 + $0x2d0] sm:$0xff]  ;;  %v273_v8 = vld [vmem:[#allocation7 + $0x1d8] sm:$0xff]  ;;  %v575_v9 = vld [vmem:[#allocation8 + $0x2c0] sm:$0xff] }
  0x4c   :  { %314 = vmatprep.subr.mxu0 %v221_v48  ;;  %624 = vmatprep.subr.mxu1 %v497_v49  ;;  %v272_v10 = vld [vmem:[#allocation7 + $0x1d0] sm:$0xff]  ;;  %v574_v11 = vld [vmem:[#allocation8 + $0x2b8] sm:$0xff]  ;;  %v271_v12 = vld [vmem:[#allocation7 + $0x1c8] sm:$0xff] }
  0x4d   :  { %315 = vmatpush1.msra.mxu0 %v220_v50  ;;  %625 = vmatpush1.msra.mxu1 %v496_v51  ;;  %v572_v13 = vld [vmem:[#allocation8 + $0x2a8] sm:$0xff]  ;;  %v270_v14 = vld [vmem:[#allocation7 + $0x1c0] sm:$0xff]  ;;  %v269_v16 = vld [vmem:[#allocation7 + $0x1b8] sm:$0xff] }
  0x4e   :  { %316 = vmatprep.subr.mxu0 %v219_v52  ;;  %626 = vmatprep.subr.mxu1 %v494_v53  ;;  %v571_v15 = vld [vmem:[#allocation8 + $0x2a0] sm:$0xff]  ;;  %v569_v17 = vld [vmem:[#allocation8 + $0x290] sm:$0xff]  ;;  %v568_v19 = vld [vmem:[#allocation8 + $0x288] sm:$0xff] }
  0x4f   :  { %317 = vmatpush1.msra.mxu0 %v218_v54  ;;  %627 = vmatpush1.msra.mxu1 %v493_v55  ;;  %v268_v18 = vld [vmem:[#allocation7 + $0x1b0] sm:$0xff]  ;;  %v267_v20 = vld [vmem:[#allocation7 + $0x1a8] sm:$0xff]  ;;  %v566_v21 = vld [vmem:[#allocation8 + $0x278] sm:$0xff] }
  0x50   :  { %318 = vmatprep.subr.mxu0 %v217_v56  ;;  %628 = vmatprep.subr.mxu1 %v491_v57  ;;  %v266_v22 = vld [vmem:[#allocation7 + $0x1a0] sm:$0xff]  ;;  %v565_v23 = vld [vmem:[#allocation8 + $0x270] sm:$0xff]  ;;  %v265_v24 = vld [vmem:[#allocation7 + $0x198] sm:$0xff] }
  0x51   :  { %319 = vmatpush1.msra.mxu0 %v216_v58  ;;  %629 = vmatpush1.msra.mxu1 %v490_v59  ;;  %v563_v25 = vld [vmem:[#allocation8 + $0x260] sm:$0xff]  ;;  %v264_v26 = vld [vmem:[#allocation7 + $0x190] sm:$0xff]  ;;  %v562_v27 = vld [vmem:[#allocation8 + $0x258] sm:$0xff] }
  0x52   :  { %320 = vmatprep.subr.mxu0 %v215_v60  ;;  %630 = vmatprep.subr.mxu1 %v488_v61  ;;  %v263_v28 = vld [vmem:[#allocation7 + $0x188] sm:$0xff]  ;;  %v262_v30 = vld [vmem:[#allocation7 + $0x180] sm:$0xff]  ;;  %v261_v32 = vld [vmem:[#allocation7 + $0x178] sm:$0xff] }
  0x53   :  { %321 = vmatpush1.msra.mxu0 %v214_v62  ;;  %631 = vmatpush1.msra.mxu1 %v487_v63  ;;  %v560_v29 = vld [vmem:[#allocation8 + $0x248] sm:$0xff]  ;;  %v559_v31 = vld [vmem:[#allocation8 + $0x240] sm:$0xff]  ;;  %v557_v33 = vld [vmem:[#allocation8 + $0x230] sm:$0xff] }
  0x54   :  { %322 = vmatprep.subr.mxu0 %v277_v0  ;;  %632 = vmatprep.subr.mxu1 %v581_v1  ;;  %v260_v34 = vld [vmem:[#allocation7 + $0x170] sm:$0xff]  ;;  %v556_v35 = vld [vmem:[#allocation8 + $0x228] sm:$0xff]  ;;  %v554_v37 = vld [vmem:[#allocation8 + $0x218] sm:$0xff] }
  0x55   :  { %323 = vmatpush2.msra.mxu0 %v276_v2  ;;  %633 = vmatpush2.msra.mxu1 %v580_v3  ;;  %v259_v36 = vld [vmem:[#allocation7 + $0x168] sm:$0xff]  ;;  %v258_v38 = vld [vmem:[#allocation7 + $0x160] sm:$0xff]  ;;  %v553_v39 = vld [vmem:[#allocation8 + $0x210] sm:$0xff] }
  0x56   :  { %324 = vmatprep.subr.mxu0 %v275_v4  ;;  %634 = vmatprep.subr.mxu1 %v578_v5  ;;  %v257_v40 = vld [vmem:[#allocation7 + $0x158] sm:$0xff]  ;;  %v551_v41 = vld [vmem:[#allocation8 + $0x200] sm:$0xff]  ;;  %v256_v42 = vld [vmem:[#allocation7 + $0x150] sm:$0xff] }
  0x57   :  { %325 = vmatpush2.msra.mxu0 %v274_v6  ;;  %635 = vmatpush2.msra.mxu1 %v577_v7  ;;  %v550_v43 = vld [vmem:[#allocation8 + $0x1f8] sm:$0xff]  ;;  %v255_v44 = vld [vmem:[#allocation7 + $0x148] sm:$0xff]  ;;  %v254_v46 = vld [vmem:[#allocation7 + $0x140] sm:$0xff] }
  0x58   :  { %326 = vmatprep.subr.mxu0 %v273_v8  ;;  %636 = vmatprep.subr.mxu1 %v575_v9  ;;  %v548_v45 = vld [vmem:[#allocation8 + $0x1e8] sm:$0xff]  ;;  %v547_v47 = vld [vmem:[#allocation8 + $0x1e0] sm:$0xff]  ;;  %v253_v48 = vld [vmem:[#allocation7 + $0x138] sm:$0xff] }
  0x59   :  { %327 = vmatpush2.msra.mxu0 %v272_v10  ;;  %637 = vmatpush2.msra.mxu1 %v574_v11  ;;  %v545_v49 = vld [vmem:[#allocation8 + $0x1d0] sm:$0xff]  ;;  %v544_v51 = vld [vmem:[#allocation8 + $0x1c8] sm:$0xff]  ;;  %v542_v53 = vld [vmem:[#allocation8 + $0x1b8] sm:$0xff] }
  0x5a   :  { %328 = vmatprep.subr.mxu0 %v271_v12  ;;  %638 = vmatprep.subr.mxu1 %v572_v13  ;;  %v252_v50 = vld [vmem:[#allocation7 + $0x130] sm:$0xff]  ;;  %v251_v52 = vld [vmem:[#allocation7 + $0x128] sm:$0xff]  ;;  %v250_v54 = vld [vmem:[#allocation7 + $0x120] sm:$0xff]  ;;  %v1330_v12 = vmov 0.0  }
  0x5b   :  { %329 = vmatpush2.msra.mxu0 %v270_v14  ;;  %639 = vmatpush2.msra.mxu1 %v571_v15  ;;  %v541_v55 = vld [vmem:[#allocation8 + $0x1b0] sm:$0xff]  ;;  %v249_v56 = vld [vmem:[#allocation7 + $0x118] sm:$0xff]  ;;  %v539_v57 = vld [vmem:[#allocation8 + $0x1a0] sm:$0xff] }
  0x5c   :  { %330 = vmatprep.subr.mxu0 %v269_v16  ;;  %640 = vmatprep.subr.mxu1 %v569_v17  ;;  %v248_v58 = vld [vmem:[#allocation7 + $0x110] sm:$0xff]  ;;  %v83_v59 = vld [vmem:[#allocation2 + $0x8] sm:$0xff]  ;;  %v538_v61 = vld [vmem:[#allocation8 + $0x198] sm:$0xff] }
  0x5d   :  { %331 = vmatpush2.msra.mxu0 %v268_v18  ;;  %641 = vmatpush2.msra.mxu1 %v568_v19  ;;  %v127_v60 = vld [vmem:[#allocation5 + $0x8] sm:$0xff]  ;;  %v82_v62 = vld [vmem:[#allocation2] sm:$0xff]  ;;  %v85_v6 = vld [vmem:[#allocation2 + $0x18] sm:$0xff] }
  0x5e   :  { %332 = vmatprep.subr.mxu0 %v267_v20  ;;  %642 = vmatprep.subr.mxu1 %v566_v21  ;;  %v126_v63 = vld [vmem:[#allocation5] sm:$0xff]  ;;  %v247_v0 = vld [vmem:[#allocation7 + $0x108] sm:$0xff]  ;;  %v1397_v3 = vadd.f32 %v127_v60, %v83_v59  ;;  %v129_v7 = vld [vmem:[#allocation5 + $0x18] sm:$0xff] }
  0x5f   :  { %333 = vmatpush2.msra.mxu0 %v266_v22  ;;  %643 = vmatpush2.msra.mxu1 %v565_v23  ;;  %v536_v1 = vld [vmem:[#allocation8 + $0x188] sm:$0xff]  ;;  %v246_v2 = vld [vmem:[#allocation7 + $0x100] sm:$0xff]  ;;  %v1399_v5 = vadd.f32 %v126_v63, %v82_v62  ;;  %v84_v8 = vld [vmem:[#allocation2 + $0x10] sm:$0xff]  ;;  %v1402_v11 = vadd.f32 %v129_v7, %v85_v6 }
  0x60   :  { %334 = vmatprep.subr.mxu0 %v265_v24  ;;  %644 = vmatprep.subr.mxu1 %v563_v25  ;;  %v535_v4 = vld [vmem:[#allocation8 + $0x180] sm:$0xff]  ;;  %v128_v9 = vld [vmem:[#allocation5 + $0x10] sm:$0xff]  ;;  %v534_v10 = vld [vmem:[#allocation8 + $0x178] sm:$0xff] }
  0x61   :  { %335 = vmatpush2.msra.mxu0 %v264_v26  ;;  %645 = vmatpush2.msra.mxu1 %v562_v27  ;;  %v1407_v13 = vadd.f32 %v128_v9, %v84_v8  ;;  %v87_v14 = vld [vmem:[#allocation2 + $0x28] sm:$0xff]  ;;  %v531_v16 = vld [vmem:[#allocation8 + $0x160] sm:$0xff]  ;;  %v89_v22 = vld [vmem:[#allocation2 + $0x38] sm:$0xff] }
  0x62   :  { %336 = vmatprep.subr.mxu0 %v263_v28  ;;  %646 = vmatprep.subr.mxu1 %v560_v29  ;;  %v131_v15 = vld [vmem:[#allocation5 + $0x28] sm:$0xff]  ;;  %v86_v17 = vld [vmem:[#allocation2 + $0x20] sm:$0xff]  ;;  %v133_v23 = vld [vmem:[#allocation5 + $0x38] sm:$0xff] }
  0x63   :  { %337 = vmatpush2.msra.mxu0 %v262_v30  ;;  %647 = vmatpush2.msra.mxu1 %v559_v31  ;;  %v130_v18 = vld [vmem:[#allocation5 + $0x20] sm:$0xff]  ;;  %v1412_v19 = vadd.f32 %v131_v15, %v87_v14  ;;  %v528_v20 = vld [vmem:[#allocation8 + $0x148] sm:$0xff]  ;;  %v88_v24 = vld [vmem:[#allocation2 + $0x30] sm:$0xff]  ;;  %v1420_v27 = vadd.f32 %v133_v23, %v89_v22 }
  0x64   :  { %338 = vmatprep.subr.mxu0 %v261_v32  ;;  %648 = vmatprep.subr.mxu1 %v557_v33  ;;  %v1415_v21 = vadd.f32 %v130_v18, %v86_v17  ;;  %v132_v25 = vld [vmem:[#allocation5 + $0x30] sm:$0xff]  ;;  %v91_v29 = vld [vmem:[#allocation2 + $0x48] sm:$0xff]  ;;  %v522_v31 = vld [vmem:[#allocation8 + $0x118] sm:$0xff] }
  0x65   :  { %339 = vmatpush2.msra.mxu0 %v260_v34  ;;  %649 = vmatpush2.msra.mxu1 %v556_v35  ;;  %v525_v26 = vld [vmem:[#allocation8 + $0x130] sm:$0xff]  ;;  %v1425_v28 = vadd.f32 %v132_v25, %v88_v24  ;;  %v135_v30 = vld [vmem:[#allocation5 + $0x48] sm:$0xff]  ;;  %v90_v32 = vld [vmem:[#allocation2 + $0x40] sm:$0xff] }
  0x66   :  { %340 = vmatprep.subr.mxu0 %v259_v36  ;;  %650 = vmatprep.subr.mxu1 %v554_v37  ;;  %v134_v33 = vld [vmem:[#allocation5 + $0x40] sm:$0xff]  ;;  %v1430_v34 = vadd.f32 %v135_v30, %v91_v29  ;;  %v93_v37 = vld [vmem:[#allocation2 + $0x58] sm:$0xff]  ;;  %v143_v60 = vld [vmem:[#allocation5 + $0x88] sm:$0xff] }
  0x67   :  { %341 = vmatpush2.msra.mxu0 %v258_v38  ;;  %651 = vmatpush2.msra.mxu1 %v553_v39  ;;  %v519_v35 = vld [vmem:[#allocation8 + $0x100] sm:$0xff]  ;;  %v1433_v36 = vadd.f32 %v134_v33, %v90_v32  ;;  %v137_v38 = vld [vmem:[#allocation5 + $0x58] sm:$0xff]  ;;  %v92_v39 = vld [vmem:[#allocation2 + $0x50] sm:$0xff] }
  0x68   :  { %342 = vmatprep.subr.mxu0 %v257_v40  ;;  %652 = vmatprep.subr.mxu1 %v551_v41  ;;  %v136_v40 = vld [vmem:[#allocation5 + $0x50] sm:$0xff]  ;;  %v516_v41 = vld [vmem:[#allocation8 + $0xe8] sm:$0xff]  ;;  %v498_v9 = vld [vmem:[#allocation8 + $0x58] sm:$0xff] }
  0x69   :  { %343 = vmatpush2.msra.mxu0 %v256_v42  ;;  %653 = vmatpush2.msra.mxu1 %v550_v43  ;;  %v1438_v42 = vadd.f32 %v137_v38, %v93_v37  ;;  %v1441_v43 = vadd.f32 %v136_v40, %v92_v39  ;;  %v504_v63 = vld [vmem:[#allocation8 + $0x88] sm:$0xff]  ;;  %v100_v7 = vld [vmem:[#allocation2 + $0x90] sm:$0xff]  ;;  %v146_v18 = vld [vmem:[#allocation5 + $0xa0] sm:$0xff] }
  0x6a   :  { %344 = vmatprep.subr.mxu0 %v255_v44  ;;  %654 = vmatprep.subr.mxu1 %v548_v45  ;;  %v95_v44 = vld [vmem:[#allocation2 + $0x68] sm:$0xff]  ;;  %v149_v25 = vld [vmem:[#allocation5 + $0xb8] sm:$0xff]  ;;  %v148_v30 = vld [vmem:[#allocation5 + $0xb0] sm:$0xff] }
  0x6b   :  { %345 = vmatpush2.msra.mxu0 %v254_v46  ;;  %655 = vmatpush2.msra.mxu1 %v547_v47  ;;  %v139_v45 = vld [vmem:[#allocation5 + $0x68] sm:$0xff]  ;;  %v513_v46 = vld [vmem:[#allocation8 + $0xd0] sm:$0xff]  ;;  %v94_v47 = vld [vmem:[#allocation2 + $0x60] sm:$0xff] }
  0x6c   :  { %346 = vmatprep.subr.mxu0 %v253_v48  ;;  %656 = vmatprep.subr.mxu1 %v545_v49  ;;  %v138_v48 = vld [vmem:[#allocation5 + $0x60] sm:$0xff]  ;;  %v1447_v49 = vadd.f32 %v139_v45, %v95_v44  ;;  %v103_v15 = vld [vmem:[#allocation2 + $0xa8] sm:$0xff]  ;;  %v582_v40 = vld [vmem:[#allocation8 + $0x2f8] sm:$0xff] }
  0x6d   :  { %347 = vmatpush2.msra.mxu0 %v252_v50  ;;  %657 = vmatpush2.msra.mxu1 %v544_v51  ;;  %v510_v50 = vld [vmem:[#allocation8 + $0xb8] sm:$0xff]  ;;  %v1451_v51 = vadd.f32 %v138_v48, %v94_v47  ;;  %v106_v38 = vld [vmem:[#allocation2 + $0xc0] sm:$0xff]  ;;  %v108_v48 = vld [vmem:[#allocation2 + $0xd0] sm:$0xff] }
  0x6e   :  { %348 = vmatprep.subr.mxu0 %v251_v52  ;;  %658 = vmatprep.subr.mxu1 %v542_v53  ;;  %v97_v52 = vld [vmem:[#allocation2 + $0x78] sm:$0xff] }
  0x6f   :  { %349 = vmatpush2.msra.mxu0 %v250_v54  ;;  %659 = vmatpush2.msra.mxu1 %v541_v55  ;;  %v141_v53 = vld [vmem:[#allocation5 + $0x78] sm:$0xff]  ;;  %v96_v54 = vld [vmem:[#allocation2 + $0x70] sm:$0xff] }
  0x70   :  { %350 = vmatprep.subr.mxu0 %v249_v56  ;;  %660 = vmatprep.subr.mxu1 %v539_v57  ;;  %v140_v55 = vld [vmem:[#allocation5 + $0x70] sm:$0xff]  ;;  %v507_v56 = vld [vmem:[#allocation8 + $0xa0] sm:$0xff]  ;;  %v1456_v57 = vadd.f32 %v141_v53, %v97_v52  ;;  %v109_v45 = vld [vmem:[#allocation2 + $0xd8] sm:$0xff] }
  0x71   :  { %351 = vmatpush2.msra.mxu0 %v248_v58  ;;  %661 = vmatpush2.msra.mxu1 %v538_v61  ;;  %v1459_v58 = vadd.f32 %v140_v55, %v96_v54  ;;  %v98_v61 = vld [vmem:[#allocation2 + $0x80] sm:$0xff]  ;;  %v576_v53 = vld [vmem:[#allocation8 + $0x2c8] sm:$0xff] }
  0x72   :  { %352 = vmatprep.subr.mxu0 %v247_v0  ;;  %662 = vmatprep.subr.mxu1 %v536_v1  ;;  %v111_v55 = vld [vmem:[#allocation2 + $0xe8] sm:$0xff] }
  0x73   :  { %353 = vmatpush2.msra.mxu0 %v246_v2  ;;  %354 = vmatprep.mubr.f32.mxu0 %v83_v59  ;;  %v99_v59 = vld [vmem:[#allocation2 + $0x88] sm:$0xff]  ;;  %v101_v2 = vld [vmem:[#allocation2 + $0x98] sm:$0xff] }
  0x74   :  { %663 = vmatpush2.msra.mxu1 %v535_v4  ;;  %664 = vmatprep.mubr.f32.mxu1 %v1397_v3  ;;  %v1464_v0 = vadd.f32 %v143_v60, %v99_v59  ;;  %v145_v4 = vld [vmem:[#allocation5 + $0x98] sm:$0xff]  ;;  %v154_v60 = vld [vmem:[#allocation5 + $0xe0] sm:$0xff] }
  0x75   :  { %355 = vmatmul.mubr.f32.vlgmr.msra.gmra.mxu0 %v82_v62  ;;  %665 = vmatmul.mubr.f32.vlgmr.msra.gmra.mxu1 %v1399_v5  ;;  %v142_v62 = vld [vmem:[#allocation5 + $0x80] sm:$0xff] }
  0x76   :  { %797 = vmatprep.subr.mxu0 %v1330_v12  ;;  %1117 = vmatprep.subr.mxu1 %v1330_v12  ;;  %v1469_v1 = vadd.f32 %v142_v62, %v98_v61 }
  0x77   :  { %798 = vmatpush1.msra.mxu0 %v534_v10  ;;  %1149 = vmatpush1.msra.mxu1 %v534_v10  ;;  %v1475_v10 = vadd.f32 %v145_v4, %v101_v2  ;;  %v157_v4 = vld [vmem:[#allocation5 + $0xf8] sm:$0xff] }
  0x78   :  { %360 = vmatprep.mubr.f32.mxu0 %v85_v6  ;;  %670 = vmatprep.mubr.f32.mxu1 %v1402_v11  ;;  %v501_v6 = vld [vmem:[#allocation8 + $0x70] sm:$0xff] }
  0x79   :  { %799 = vmatprep.subr.mxu0 %v1330_v12  ;;  %1118 = vmatprep.subr.mxu1 %v1330_v12 }
  0x7a   :  { %361 = vmatmul.mubr.f32.gmra.mxu0 %v84_v8  ;;  %671 = vmatmul.mubr.f32.gmra.mxu1 %v1407_v13  ;;  %v144_v8 = vld [vmem:[#allocation5 + $0x90] sm:$0xff] }
  0x7b   :  { %800 = vmatpush1.msra.mxu0 %v531_v16  ;;  %1150 = vmatpush1.msra.mxu1 %v531_v16  ;;  %v147_v16 = vld [vmem:[#allocation5 + $0xa8] sm:$0xff] }
  0x7c   :  { %801 = vmatprep.subr.mxu0 %v1330_v12  ;;  %1119 = vmatprep.subr.mxu1 %v1330_v12 }
  0x7d   :  { %366 = vmatprep.mubr.f32.mxu0 %v87_v14  ;;  %676 = vmatprep.mubr.f32.mxu1 %v1412_v19  ;;  %v1477_v14 = vadd.f32 %v144_v8, %v100_v7  ;;  %v156_v8 = vld [vmem:[#allocation5 + $0xf0] sm:$0xff] }
  0x7e   :  { %802 = vmatpush1.msra.mxu0 %v528_v20  ;;  %1151 = vmatpush1.msra.mxu1 %v528_v20  ;;  %v495_v20 = vld [vmem:[#allocation8 + $0x40] sm:$0xff] }
  0x7f   :  { %367 = vmatmul.mubr.f32.gmra.mxu0 %v86_v17  ;;  %677 = vmatmul.mubr.f32.gmra.mxu1 %v1415_v21  ;;  %v102_v17 = vld [vmem:[#allocation2 + $0xa0] sm:$0xff] }
  0x80   :  { %803 = vmatprep.subr.mxu0 %v1330_v12  ;;  %1120 = vmatprep.subr.mxu1 %v1330_v12  ;;  %v1487_v23 = vadd.f32 %v146_v18, %v102_v17  ;;  %v159_v18 = vld [vmem:[#allocation5 + $0x108] sm:$0xff] }
  0x81   :  { %804 = vmatpush1.msra.mxu0 %v525_v26  ;;  %1152 = vmatpush1.msra.mxu1 %v525_v26  ;;  %v492_v26 = vld [vmem:[#allocation8 + $0x28] sm:$0xff] }
  0x82   :  { %372 = vmatprep.mubr.f32.mxu0 %v89_v22  ;;  %682 = vmatprep.mubr.f32.mxu1 %v1420_v27  ;;  %v1482_v22 = vadd.f32 %v147_v16, %v103_v15 }
  0x83   :  { %805 = vmatprep.subr.mxu0 %v1330_v12  ;;  %1121 = vmatprep.subr.mxu1 %v1330_v12 }
  0x84   :  { %373 = vmatmul.mubr.f32.gmra.mxu0 %v88_v24  ;;  %683 = vmatmul.mubr.f32.gmra.mxu1 %v1425_v28  ;;  %v105_v24 = vld [vmem:[#allocation2 + $0xb8] sm:$0xff] }
  0x85   :  { %806 = vmatpush1.msra.mxu0 %v522_v31  ;;  %1153 = vmatpush1.msra.mxu1 %v522_v31  ;;  %v1492_v31 = vadd.f32 %v149_v25, %v105_v24  ;;  %v564_v25 = vld [vmem:[#allocation8 + $0x268] sm:$0xff] }
  0x86   :  { %807 = vmatprep.subr.mxu0 %v1330_v12  ;;  %1122 = vmatprep.subr.mxu1 %v1330_v12 }
  0x87   :  { %378 = vmatprep.mubr.f32.mxu0 %v91_v29  ;;  %688 = vmatprep.mubr.f32.mxu1 %v1430_v34  ;;  %v104_v29 = vld [vmem:[#allocation2 + $0xb0] sm:$0xff] }
  0x88   :  { %808 = vmatpush1.msra.mxu0 %v519_v35  ;;  %1154 = vmatpush1.msra.mxu1 %v519_v35  ;;  %v1495_v33 = vadd.f32 %v148_v30, %v104_v29  ;;  %v107_v35 = vld [vmem:[#allocation2 + $0xc8] sm:$0xff]  ;;  %v117_v30 = vld [vmem:[#allocation2 + $0x118] sm:$0xff] }
  0x89   :  { %379 = vmatmul.mubr.f32.gmra.mxu0 %v90_v32  ;;  %689 = vmatmul.mubr.f32.gmra.mxu1 %v1433_v36  ;;  %v489_v32 = vld [vmem:[#allocation8 + $0x10] sm:$0xff] }
  0x8a   :  { %809 = vmatprep.subr.mxu0 %v1330_v12  ;;  %1123 = vmatprep.subr.mxu1 %v1330_v12 }
  0x8b   :  { %810 = vmatpush1.msra.mxu0 %v516_v41  ;;  %1155 = vmatpush1.msra.mxu1 %v516_v41 }
  0x8c   :  { %384 = vmatprep.mubr.f32.mxu0 %v93_v37  ;;  %694 = vmatprep.mubr.f32.mxu1 %v1438_v42  ;;  %v151_v37 = vld [vmem:[#allocation5 + $0xc8] sm:$0xff] }
  0x8d   :  { %385 = vmatmul.mubr.f32.gmra.mxu0 %v92_v39  ;;  %695 = vmatmul.mubr.f32.gmra.mxu1 %v1441_v43  ;;  %v150_v39 = vld [vmem:[#allocation5 + $0xc0] sm:$0xff]  ;;  %v1500_v41 = vadd.f32 %v151_v37, %v107_v35  ;;  %v116_v37 = vld [vmem:[#allocation2 + $0x110] sm:$0xff] }
  0x8e   :  { %811 = vmatprep.subr.mxu0 %v1330_v12  ;;  %1124 = vmatprep.subr.mxu1 %v1330_v12 }
  0x8f   :  { %812 = vmatpush1.msra.mxu0 %v513_v46  ;;  %1156 = vmatpush1.msra.mxu1 %v513_v46  ;;  %v153_v46 = vld [vmem:[#allocation5 + $0xd8] sm:$0xff] }
  0x90   :  { %813 = vmatprep.subr.mxu0 %v1330_v12  ;;  %1125 = vmatprep.subr.mxu1 %v1330_v12 }
  0x91   :  { %390 = vmatprep.mubr.f32.mxu0 %v95_v44  ;;  %700 = vmatprep.mubr.f32.mxu1 %v1447_v49  ;;  %v1505_v44 = vadd.f32 %v150_v39, %v106_v38 }
  0x92   :  { %814 = vmatpush1.msra.mxu0 %v510_v50  ;;  %1157 = vmatpush1.msra.mxu1 %v510_v50  ;;  %v152_v50 = vld [vmem:[#allocation5 + $0xd0] sm:$0xff] }
  0x93   :  { %391 = vmatmul.mubr.f32.gmra.mxu0 %v94_v47  ;;  %701 = vmatmul.mubr.f32.gmra.mxu1 %v1451_v51  ;;  %v579_v47 = vld [vmem:[#allocation8 + $0x2e0] sm:$0xff] }
  0x94   :  { %815 = vmatprep.subr.mxu0 %v1330_v12  ;;  %1126 = vmatprep.subr.mxu1 %v1330_v12 }
  0x95   :  { %816 = vmatpush1.msra.mxu0 %v507_v56  ;;  %1158 = vmatpush1.msra.mxu1 %v507_v56  ;;  %v155_v56 = vld [vmem:[#allocation5 + $0xe8] sm:$0xff] }
  0x96   :  { %396 = vmatprep.mubr.f32.mxu0 %v97_v52  ;;  %706 = vmatprep.mubr.f32.mxu1 %v1456_v57  ;;  %v1510_v52 = vadd.f32 %v153_v46, %v109_v45  ;;  %v1518_v62 = vadd.f32 %v155_v56, %v111_v55  ;;  %v119_v46 = vld [vmem:[#allocation2 + $0x128] sm:$0xff] }
  0x97   :  { %397 = vmatmul.mubr.f32.gmra.mxu0 %v96_v54  ;;  %707 = vmatmul.mubr.f32.gmra.mxu1 %v1459_v58  ;;  %v1513_v54 = vadd.f32 %v152_v50, %v108_v48  ;;  %v162_v50 = vld [vmem:[#allocation5 + $0x120] sm:$0xff] }
  0x98   :  { %817 = vmatprep.subr.mxu0 %v1330_v12  ;;  %1127 = vmatprep.subr.mxu1 %v1330_v12 }
  0x99   :  { %818 = vmatpush1.msra.mxu0 %v504_v63  ;;  %1159 = vmatpush1.msra.mxu1 %v504_v63 }
  0x9a   :  { %402 = vmatprep.mubr.f32.mxu0 %v99_v59  ;;  %712 = vmatprep.mubr.f32.mxu1 %v1464_v0  ;;  %v110_v59 = vld [vmem:[#allocation2 + $0xe0] sm:$0xff] }
  0x9b   :  { %819 = vmatprep.subr.mxu0 %v1330_v12  ;;  %1128 = vmatprep.subr.mxu1 %v1330_v12  ;;  %v1523_v63 = vadd.f32 %v154_v60, %v110_v59  ;;  %v165_v60 = vld [vmem:[#allocation5 + $0x138] sm:$0xff] }
  0x9c   :  { %403 = vmatmul.mubr.f32.gmra.mxu0 %v98_v61  ;;  %713 = vmatmul.mubr.f32.gmra.mxu1 %v1469_v1  ;;  %v573_v61 = vld [vmem:[#allocation8 + $0x2b0] sm:$0xff] }
  0x9d   :  { %820 = vmatpush1.msra.mxu0 %v501_v6  ;;  %1160 = vmatpush1.msra.mxu1 %v501_v6  ;;  %v570_v6 = vld [vmem:[#allocation8 + $0x298] sm:$0xff] }
  0x9e   :  { %821 = vmatprep.subr.mxu0 %v1330_v12  ;;  %1129 = vmatprep.subr.mxu1 %v1330_v12 }
  0x9f   :  { %822 = vmatpush1.msra.mxu0 %v498_v9  ;;  %1161 = vmatpush1.msra.mxu1 %v498_v9 }
  0xa0   :  { %408 = vmatprep.mubr.f32.mxu0 %v101_v2  ;;  %718 = vmatprep.mubr.f32.mxu1 %v1475_v10  ;;  %v113_v2 = vld [vmem:[#allocation2 + $0xf8] sm:$0xff] }
  0xa1   :  { %409 = vmatmul.mubr.f32.gmra.mxu0 %v100_v7  ;;  %719 = vmatmul.mubr.f32.gmra.mxu1 %v1477_v14  ;;  %v112_v7 = vld [vmem:[#allocation2 + $0xf0] sm:$0xff]  ;;  %v1528_v9 = vadd.f32 %v157_v4, %v113_v2  ;;  %v552_v4 = vld [vmem:[#allocation8 + $0x208] sm:$0xff] }
  0xa2   :  { %823 = vmatprep.subr.mxu0 %v1330_v12  ;;  %1130 = vmatprep.subr.mxu1 %v1330_v12  ;;  %v1531_v16 = vadd.f32 %v156_v8, %v112_v7  ;;  %v123_v8 = vld [vmem:[#allocation2 + $0x148] sm:$0xff] }
  0xa3   :  { %824 = vmatpush1.msra.mxu0 %v495_v20  ;;  %1162 = vmatpush1.msra.mxu1 %v495_v20  ;;  %v114_v20 = vld [vmem:[#allocation2 + $0x100] sm:$0xff] }
  0xa4   :  { %414 = vmatprep.mubr.f32.mxu0 %v103_v15  ;;  %724 = vmatprep.mubr.f32.mxu1 %v1482_v22  ;;  %v567_v15 = vld [vmem:[#allocation8 + $0x280] sm:$0xff] }
  0xa5   :  { %825 = vmatprep.subr.mxu0 %v1330_v12  ;;  %1131 = vmatprep.subr.mxu1 %v1330_v12 }
  0xa6   :  { %415 = vmatmul.mubr.f32.gmra.mxu0 %v102_v17  ;;  %725 = vmatmul.mubr.f32.gmra.mxu1 %v1487_v23  ;;  %v115_v17 = vld [vmem:[#allocation2 + $0x108] sm:$0xff] }
  0xa7   :  { %826 = vmatpush1.msra.mxu0 %v492_v26  ;;  %1163 = vmatpush1.msra.mxu1 %v492_v26  ;;  %v1536_v26 = vadd.f32 %v159_v18, %v115_v17  ;;  %v122_v18 = vld [vmem:[#allocation2 + $0x140] sm:$0xff] }
  0xa8   :  { %827 = vmatprep.subr.mxu0 %v1330_v12  ;;  %1132 = vmatprep.subr.mxu1 %v1330_v12 }
  0xa9   :  { %420 = vmatprep.mubr.f32.mxu0 %v105_v24  ;;  %730 = vmatprep.mubr.f32.mxu1 %v1492_v31  ;;  %v158_v24 = vld [vmem:[#allocation5 + $0x100] sm:$0xff] }
  0xaa   :  { %828 = vmatpush1.msra.mxu0 %v489_v32  ;;  %1164 = vmatpush1.msra.mxu1 %v489_v32  ;;  %v161_v32 = vld [vmem:[#allocation5 + $0x118] sm:$0xff] }
  0xab   :  { %421 = vmatmul.mubr.f32.gmra.mxu0 %v104_v29  ;;  %731 = vmatmul.mubr.f32.gmra.mxu1 %v1495_v33  ;;  %v1539_v29 = vadd.f32 %v158_v24, %v114_v20  ;;  %v1545_v39 = vadd.f32 %v161_v32, %v117_v30  ;;  %v546_v24 = vld [vmem:[#allocation8 + $0x1d8] sm:$0xff] }
  0xac   :  { %829 = vmatprep.subr.mxu0 %v1330_v12  ;;  %1133 = vmatprep.subr.mxu1 %v1330_v12  ;;  %v125_v32 = vld [vmem:[#allocation2 + $0x158] sm:$0xff] }
  0xad   :  { %830 = vmatpush2.msra.mxu0 %v582_v40  ;;  %1165 = vmatpush2.msra.mxu1 %v582_v40  ;;  %v558_v40 = vld [vmem:[#allocation8 + $0x238] sm:$0xff] }
  0xae   :  { %426 = vmatprep.mubr.f32.mxu0 %v107_v35  ;;  %736 = vmatprep.mubr.f32.mxu1 %v1500_v41  ;;  %v561_v35 = vld [vmem:[#allocation8 + $0x250] sm:$0xff] }
  0xaf   :  { %831 = vmatprep.subr.mxu0 %v1330_v12  ;;  %1134 = vmatprep.subr.mxu1 %v1330_v12 }
  0xb0   :  { %427 = vmatmul.mubr.f32.gmra.mxu0 %v106_v38  ;;  %737 = vmatmul.mubr.f32.gmra.mxu1 %v1505_v44  ;;  %v160_v38 = vld [vmem:[#allocation5 + $0x110] sm:$0xff] }
  0xb1   :  { %832 = vmatpush2.msra.mxu0 %v579_v47  ;;  %1166 = vmatpush2.msra.mxu1 %v579_v47  ;;  %v163_v47 = vld [vmem:[#allocation5 + $0x128] sm:$0xff] }
  0xb2   :  { %833 = vmatprep.subr.mxu0 %v1330_v12  ;;  %1135 = vmatprep.subr.mxu1 %v1330_v12 }
  0xb3   :  { %432 = vmatprep.mubr.f32.mxu0 %v109_v45  ;;  %742 = vmatprep.mubr.f32.mxu1 %v1510_v52  ;;  %v1549_v45 = vadd.f32 %v160_v38, %v116_v37  ;;  %v168_v38 = vld [vmem:[#allocation5 + $0x150] sm:$0xff] }
  0xb4   :  { %834 = vmatpush2.msra.mxu0 %v576_v53  ;;  %1167 = vmatpush2.msra.mxu1 %v576_v53  ;;  %v555_v53 = vld [vmem:[#allocation8 + $0x220] sm:$0xff] }
  0xb5   :  { %433 = vmatmul.mubr.f32.gmra.mxu0 %v108_v48  ;;  %743 = vmatmul.mubr.f32.gmra.mxu1 %v1513_v54  ;;  %v118_v48 = vld [vmem:[#allocation2 + $0x120] sm:$0xff] }
  0xb6   :  { %835 = vmatprep.subr.mxu0 %v1330_v12  ;;  %1136 = vmatprep.subr.mxu1 %v1330_v12  ;;  %v1557_v56 = vadd.f32 %v162_v50, %v118_v48  ;;  %v537_v50 = vld [vmem:[#allocation8 + $0x190] sm:$0xff] }
  0xb7   :  { %836 = vmatpush2.msra.mxu0 %v573_v61  ;;  %1168 = vmatpush2.msra.mxu1 %v573_v61  ;;  %v120_v61 = vld [vmem:[#allocation2 + $0x130] sm:$0xff] }
  0xb8   :  { %438 = vmatprep.mubr.f32.mxu0 %v111_v55  ;;  %748 = vmatprep.mubr.f32.mxu1 %v1518_v62  ;;  %v1554_v55 = vadd.f32 %v163_v47, %v119_v46 }
  0xb9   :  { %837 = vmatprep.subr.mxu0 %v1330_v12  ;;  %1137 = vmatprep.subr.mxu1 %v1330_v12 }
  0xba   :  { %439 = vmatmul.mubr.f32.gmra.mxu0 %v110_v59  ;;  %749 = vmatmul.mubr.f32.gmra.mxu1 %v1523_v63  ;;  %v121_v59 = vld [vmem:[#allocation2 + $0x138] sm:$0xff] }
  0xbb   :  { %838 = vmatpush2.msra.mxu0 %v570_v6  ;;  %1169 = vmatpush2.msra.mxu1 %v570_v6  ;;  %v1562_v6 = vadd.f32 %v165_v60, %v121_v59 }
  0xbc   :  { %839 = vmatprep.subr.mxu0 %v1330_v12  ;;  %1138 = vmatprep.subr.mxu1 %v1330_v12 }
  0xbd   :  { %444 = vmatprep.mubr.f32.mxu0 %v113_v2  ;;  %754 = vmatprep.mubr.f32.mxu1 %v1528_v9  ;;  %v164_v2 = vld [vmem:[#allocation5 + $0x130] sm:$0xff] }
  0xbe   :  { %840 = vmatpush2.msra.mxu0 %v567_v15  ;;  %1170 = vmatpush2.msra.mxu1 %v567_v15  ;;  %v167_v15 = vld [vmem:[#allocation5 + $0x148] sm:$0xff] }
  0xbf   :  { %445 = vmatmul.mubr.f32.gmra.mxu0 %v112_v7  ;;  %755 = vmatmul.mubr.f32.gmra.mxu1 %v1531_v16  ;;  %v1567_v7 = vadd.f32 %v164_v2, %v120_v61 }
  0xc0   :  { %841 = vmatprep.subr.mxu0 %v1330_v12  ;;  %1139 = vmatprep.subr.mxu1 %v1330_v12 }
  0xc1   :  { %842 = vmatpush2.msra.mxu0 %v564_v25  ;;  %1171 = vmatpush2.msra.mxu1 %v564_v25  ;;  %v1573_v25 = vadd.f32 %v167_v15, %v123_v8 }
  0xc2   :  { %450 = vmatprep.mubr.f32.mxu0 %v115_v17  ;;  %760 = vmatprep.mubr.f32.mxu1 %v1536_v26  ;;  %v549_v17 = vld [vmem:[#allocation8 + $0x1f0] sm:$0xff] }
  0xc3   :  { %451 = vmatmul.mubr.f32.gmra.mxu0 %v114_v20  ;;  %761 = vmatmul.mubr.f32.gmra.mxu1 %v1539_v29  ;;  %v166_v20 = vld [vmem:[#allocation5 + $0x140] sm:$0xff] }
  0xc4   :  { %843 = vmatprep.subr.mxu0 %v1330_v12  ;;  %1140 = vmatprep.subr.mxu1 %v1330_v12 }
  0xc5   :  { %844 = vmatpush2.msra.mxu0 %v561_v35  ;;  %1172 = vmatpush2.msra.mxu1 %v561_v35  ;;  %v169_v35 = vld [vmem:[#allocation5 + $0x158] sm:$0xff] }
  0xc6   :  { %845 = vmatprep.subr.mxu0 %v1330_v12  ;;  %1141 = vmatprep.subr.mxu1 %v1330_v12 }
  0xc7   :  { %456 = vmatprep.mubr.f32.mxu0 %v117_v30  ;;  %766 = vmatprep.mubr.f32.mxu1 %v1545_v39  ;;  %v1575_v30 = vadd.f32 %v166_v20, %v122_v18 }
  0xc8   :  { %846 = vmatpush2.msra.mxu0 %v558_v40  ;;  %1173 = vmatpush2.msra.mxu1 %v558_v40  ;;  %v543_v40 = vld [vmem:[#allocation8 + $0x1c0] sm:$0xff] }
  0xc9   :  { %457 = vmatmul.mubr.f32.gmra.mxu0 %v116_v37  ;;  %767 = vmatmul.mubr.f32.gmra.mxu1 %v1549_v45  ;;  %v124_v37 = vld [vmem:[#allocation2 + $0x150] sm:$0xff] }
  0xca   :  { %847 = vmatprep.subr.mxu0 %v1330_v12  ;;  %1142 = vmatprep.subr.mxu1 %v1330_v12  ;;  %v212_v47 = vadd.f32 %v168_v38, %v124_v37 }
  0xcb   :  { %848 = vmatpush2.msra.mxu0 %v555_v53  ;;  %1174 = vmatpush2.msra.mxu1 %v555_v53 }
  0xcc   :  { %462 = vmatprep.mubr.f32.mxu0 %v119_v46  ;;  %772 = vmatprep.mubr.f32.mxu1 %v1554_v55  ;;  %v213_v46 = vadd.f32 %v169_v35, %v125_v32 }
  0xcd   :  { %463 = vmatmul.mubr.f32.gmra.mxu0 %v118_v48  ;;  %773 = vmatmul.mubr.f32.gmra.mxu1 %v1557_v56  ;;  %v540_v48 = vld [vmem:[#allocation8 + $0x1a8] sm:$0xff] }
  0xce   :  { %849 = vmatprep.subr.mxu0 %v1330_v12  ;;  %1143 = vmatprep.subr.mxu1 %v1330_v12 }
  0xcf   :  { %850 = vmatpush2.msra.mxu0 %v552_v4  ;;  %1175 = vmatpush2.msra.mxu1 %v552_v4 }
  0xd0   :  { %468 = vmatprep.mubr.f32.mxu0 %v121_v59  ;;  %778 = vmatprep.mubr.f32.mxu1 %v1562_v6 }
  0xd1   :  { %851 = vmatprep.subr.mxu0 %v1330_v12  ;;  %1144 = vmatprep.subr.mxu1 %v1330_v12 }
  0xd2   :  { %469 = vmatmul.mubr.f32.gmra.mxu0 %v120_v61  ;;  %779 = vmatmul.mubr.f32.gmra.mxu1 %v1567_v7 }
  0xd3   :  { %852 = vmatpush2.msra.mxu0 %v549_v17  ;;  %1176 = vmatpush2.msra.mxu1 %v549_v17 }
  0xd4   :  { %853 = vmatprep.subr.mxu0 %v1330_v12  ;;  %1145 = vmatprep.subr.mxu1 %v1330_v12 }
  0xd5   :  { %854 = vmatpush2.msra.mxu0 %v546_v24  ;;  %1177 = vmatpush2.msra.mxu1 %v546_v24 }
  0xd6   :  { %474 = vmatprep.mubr.f32.mxu0 %v123_v8  ;;  %784 = vmatprep.mubr.f32.mxu1 %v1573_v25 }
  0xd7   :  { %475 = vmatmul.mubr.f32.gmra.mxu0 %v122_v18  ;;  %785 = vmatmul.mubr.f32.gmra.mxu1 %v1575_v30 }
  0xd8   :  { %855 = vmatprep.subr.mxu0 %v1330_v12  ;;  %1146 = vmatprep.subr.mxu1 %v1330_v12 }
  0xd9   :  { %856 = vmatpush2.msra.mxu0 %v543_v40  ;;  %1178 = vmatpush2.msra.mxu1 %v543_v40 }
  0xda   :  { %480 = vmatprep.mubr.f32.mxu0 %v125_v32  ;;  %790 = vmatprep.mubr.f32.mxu1 %v213_v46 }
  0xdb   :  { %857 = vmatprep.subr.mxu0 %v1330_v12  ;;  %1147 = vmatprep.subr.mxu1 %v1330_v12 }
  0xdc   :  { %481 = vmatmul.mubr.f32.gmra.mxu0 %v124_v37  ;;  %791 = vmatmul.mubr.f32.gmra.mxu1 %v212_v47 }
  0xdd   :  { %858 = vmatpush2.msra.mxu0 %v540_v48  ;;  %1179 = vmatpush2.msra.mxu1 %v540_v48 }
  0xde   :  { %859 = vmatprep.subr.mxu0 %v1330_v12  ;;  %1148 = vmatprep.subr.mxu1 %v1330_v12  ;;  %v278_v12 = vld [vmem:[%s1780_s3] sm:$0x3]  ;;  %s1331_s3 = smov [#allocation10]  }
  0xdf   :  { %860 = vmatpush2.msra.mxu0 %v537_v50  ;;  %1180 = vmatpush2.msra.mxu1 %v537_v50 }
  0xe0   :  { %861 = vmatprep.mubr.f32.mxu0 %v1397_v3  ;;  %916 = vmatprep.mubr.f32.mxu1 %v1492_v31  ;;  %v280_v3 = vlaneseq }
  0xe1   :  { %862 = vmatmul.mubr.f32.vlgmr.msra.gmra.mxu0 %v1399_v5  ;;  %917 = vmatmul.mubr.f32.vlgmr.msra.gmra.mxu1 %v1495_v33 }
  0xe2   :  { %866 = vmatprep.mubr.f32.mxu0 %v1402_v11  ;;  %921 = vmatprep.mubr.f32.mxu1 %v1500_v41  ;;  %v1629_v5 = vshrl.u32 %v280_v3, 7 }
  0xe4   :  { %v282_v11 = vsub.s32 0, %v1629_v5 }
  0xe5   :  { %867 = vmatmul.mubr.f32.gmra.mxu0 %v1407_v13  ;;  %922 = vmatmul.mubr.f32.gmra.mxu1 %v1505_v44  ;;  %v1638_v13 = vld [vmem:[%s1782_s5] sm:$0x7]  ;;  %s1087_s5 = sshll.u32 %s1331_s3, 4  ;;  %s1088_s5 = int_to_ptr.vmem [resolvable:$true] %s1087_s5 }
  0xe6   :  { %871 = vmatprep.mubr.f32.mxu0 %v1412_v19  ;;  %926 = vmatprep.mubr.f32.mxu1 %v1510_v52  ;;  %v286_v19 = vsub.s32 1, %v1629_v5  ;;  %s1272_s25 = scalar_lea.vmem %s1088_s5, 5632  ;;  %p1277_p7 = scmp.lt.s32.totalorder %s1088_s5, %s1088_s5 }
  0xe7   :  { %p1273_p6 = scmp.ne.s32.totalorder %s1088_s5, %s1272_s25  ;;  %p1278_p8 = scmp.lt.s32.totalorder %s1272_s25, %s1272_s25 }
  0xe9   :  { %872 = vmatmul.mubr.f32.gmra.mxu0 %v1415_v21  ;;  %927 = vmatmul.mubr.f32.gmra.mxu1 %v1513_v54  ;;  %v1641_v21 = vrot.slane %v278_v12, %v282_v11  ;;  %p1279_p9 = por %p1278_p8, %p1277_p7 }
  0xea   :  { %876 = vmatprep.mubr.f32.mxu0 %v1420_v27  ;;  %931 = vmatprep.mubr.f32.mxu1 %v1518_v62  ;;  %v1644_v27 = vrot.slane %v1638_v13, %v282_v11 }
  0xeb   :  { %p1280_p10 = pnand %p1279_p9, %p1273_p6 }
  0xed   :  { %877 = vmatmul.mubr.f32.gmra.mxu0 %v1425_v28  ;;  %932 = vmatmul.mubr.f32.gmra.mxu1 %v1523_v63  ;;  %v1646_v28 = vrot.slane %v278_v12, %v286_v19 }
  0xee   :  { %881 = vmatprep.mubr.f32.mxu0 %v1430_v34  ;;  %936 = vmatprep.mubr.f32.mxu1 %v1528_v9  ;;  %v1649_v34 = vrot.slane %v1638_v13, %v286_v19 }
  0xf1   :  { %882 = vmatmul.mubr.f32.gmra.mxu0 %v1433_v36  ;;  %937 = vmatmul.mubr.f32.gmra.mxu1 %v1531_v16 }
  0xf2   :  { %886 = vmatprep.mubr.f32.mxu0 %v1438_v42  ;;  %941 = vmatprep.mubr.f32.mxu1 %v1536_v26 }
  0xf5   :  { %887 = vmatmul.mubr.f32.gmra.mxu0 %v1441_v43  ;;  %942 = vmatmul.mubr.f32.gmra.mxu1 %v1539_v29 }
  0xf6   :  { %891 = vmatprep.mubr.f32.mxu0 %v1447_v49  ;;  %946 = vmatprep.mubr.f32.mxu1 %v1545_v39 }
  0xf9   :  { %892 = vmatmul.mubr.f32.gmra.mxu0 %v1451_v51  ;;  %947 = vmatmul.mubr.f32.gmra.mxu1 %v1549_v45 }
  0xfa   :  { %896 = vmatprep.mubr.f32.mxu0 %v1456_v57  ;;  %951 = vmatprep.mubr.f32.mxu1 %v1554_v55 }
  0xfd   :  { %897 = vmatmul.mubr.f32.gmra.mxu0 %v1459_v58  ;;  %952 = vmatmul.mubr.f32.gmra.mxu1 %v1557_v56 }
  0xfe   :  { %901 = vmatprep.mubr.f32.mxu0 %v1464_v0  ;;  %956 = vmatprep.mubr.f32.mxu1 %v1562_v6 }
 0x101   :  { %902 = vmatmul.mubr.f32.gmra.mxu0 %v1469_v1  ;;  %957 = vmatmul.mubr.f32.gmra.mxu1 %v1567_v7 }
 0x102   :  { %906 = vmatprep.mubr.f32.mxu0 %v1475_v10  ;;  %961 = vmatprep.mubr.f32.mxu1 %v1573_v25 }
 0x105   :  { %907 = vmatmul.mubr.f32.gmra.mxu0 %v1477_v14  ;;  %962 = vmatmul.mubr.f32.gmra.mxu1 %v1575_v30 }
 0x106   :  { %911 = vmatprep.mubr.f32.mxu0 %v1482_v22  ;;  %966 = vmatprep.mubr.f32.mxu1 %v213_v46 }
 0x109   :  { %912 = vmatmul.mubr.f32.gmra.mxu0 %v1487_v23  ;;  %967 = vmatmul.mubr.f32.gmra.mxu1 %v212_v47 }
 0x135   :  { %v356_v36 = vpop.f32.mrf.mxu0  ;;  %v666_v42 = vpop.f32.mrf.mxu1 }
 0x136   :  { %v357_v43 = vadd.f32 %v356_v36, %v1641_v21  ;;  %v667_v49 = vadd.f32 %v666_v42, %v1644_v27 }
 0x137   :  { %v358_v51 = vpop.f32.mrf.mxu0  ;;  %v668_v57 = vpop.f32.mrf.mxu1 }
 0x138   :  { %972 = vst [vmem:[#allocation10] sm:$0xff] %v357_v43  ;;  %1016 = vst [vmem:[#allocation11] sm:$0xff] %v667_v49  ;;  %v359_v58 = vadd.f32 %v358_v51, %v1646_v28  ;;  %v669_v0 = vadd.f32 %v668_v57, %v1649_v34 }
 0x13a   :  { %973 = vst [vmem:[#allocation10 + $0x8] sm:$0xff] %v359_v58  ;;  %1017 = vst [vmem:[#allocation11 + $0x8] sm:$0xff] %v669_v0  ;;  %v362_v1 = vpop.f32.mrf.mxu0  ;;  %v672_v10 = vpop.f32.mrf.mxu1 }
 0x13b   :  { %v363_v14 = vadd.f32 %v362_v1, %v1641_v21  ;;  %v673_v22 = vadd.f32 %v672_v10, %v1644_v27 }
 0x13c   :  { %v364_v23 = vpop.f32.mrf.mxu0  ;;  %v674_v31 = vpop.f32.mrf.mxu1 }
 0x13d   :  { %974 = vst [vmem:[#allocation10 + $0x10] sm:$0xff] %v363_v14  ;;  %1019 = vst [vmem:[#allocation11 + $0x18] sm:$0xff] %v673_v22  ;;  %v365_v33 = vadd.f32 %v364_v23, %v1646_v28  ;;  %v675_v41 = vadd.f32 %v674_v31, %v1649_v34 }
 0x13f   :  { %975 = vst [vmem:[#allocation10 + $0x18] sm:$0xff] %v365_v33  ;;  %1020 = vst [vmem:[#allocation11 + $0x20] sm:$0xff] %v675_v41  ;;  %v368_v44 = vpop.f32.mrf.mxu0  ;;  %v678_v52 = vpop.f32.mrf.mxu1 }
 0x140   :  { %v369_v54 = vadd.f32 %v368_v44, %v1641_v21  ;;  %v679_v62 = vadd.f32 %v678_v52, %v1644_v27 }
 0x141   :  { %v370_v63 = vpop.f32.mrf.mxu0  ;;  %v680_v9 = vpop.f32.mrf.mxu1 }
 0x142   :  { %976 = vst [vmem:[#allocation10 + $0x20] sm:$0xff] %v369_v54  ;;  %1022 = vst [vmem:[#allocation11 + $0x30] sm:$0xff] %v679_v62  ;;  %v371_v16 = vadd.f32 %v370_v63, %v1646_v28  ;;  %v681_v26 = vadd.f32 %v680_v9, %v1649_v34 }
 0x144   :  { %977 = vst [vmem:[#allocation10 + $0x28] sm:$0xff] %v371_v16  ;;  %1023 = vst [vmem:[#allocation11 + $0x38] sm:$0xff] %v681_v26  ;;  %v374_v29 = vpop.f32.mrf.mxu0  ;;  %v684_v39 = vpop.f32.mrf.mxu1 }
 0x145   :  { %v375_v45 = vadd.f32 %v374_v29, %v1641_v21  ;;  %v685_v53 = vadd.f32 %v684_v39, %v1644_v27 }
 0x146   :  { %v376_v55 = vpop.f32.mrf.mxu0  ;;  %v686_v56 = vpop.f32.mrf.mxu1 }
 0x147   :  { %978 = vst [vmem:[#allocation10 + $0x30] sm:$0xff] %v375_v45  ;;  %1025 = vst [vmem:[#allocation11 + $0x48] sm:$0xff] %v685_v53  ;;  %v377_v59 = vadd.f32 %v376_v55, %v1646_v28  ;;  %v687_v60 = vadd.f32 %v686_v56, %v1649_v34 }
 0x149   :  { %979 = vst [vmem:[#allocation10 + $0x38] sm:$0xff] %v377_v59  ;;  %1026 = vst [vmem:[#allocation11 + $0x50] sm:$0xff] %v687_v60  ;;  %v380_v61 = vpop.f32.mrf.mxu0  ;;  %v690_v2 = vpop.f32.mrf.mxu1 }
 0x14a   :  { %v381_v4 = vadd.f32 %v380_v61, %v1641_v21  ;;  %v691_v6 = vadd.f32 %v690_v2, %v1644_v27 }
 0x14b   :  { %v382_v7 = vpop.f32.mrf.mxu0  ;;  %v692_v8 = vpop.f32.mrf.mxu1 }
 0x14c   :  { %980 = vst [vmem:[#allocation10 + $0x40] sm:$0xff] %v381_v4  ;;  %1028 = vst [vmem:[#allocation11 + $0x60] sm:$0xff] %v691_v6  ;;  %v383_v15 = vadd.f32 %v382_v7, %v1646_v28  ;;  %v693_v17 = vadd.f32 %v692_v8, %v1649_v34 }
 0x14d   :  { %v386_v18 = vpop.f32.mrf.mxu0  ;;  %v696_v20 = vpop.f32.mrf.mxu1 }
 0x14e   :  { %981 = vst [vmem:[#allocation10 + $0x48] sm:$0xff] %v383_v15  ;;  %1029 = vst [vmem:[#allocation11 + $0x68] sm:$0xff] %v693_v17  ;;  %v387_v24 = vadd.f32 %v386_v18, %v1641_v21  ;;  %v697_v25 = vadd.f32 %v696_v20, %v1644_v27 }
 0x14f   :  { %v388_v30 = vpop.f32.mrf.mxu0  ;;  %v698_v32 = vpop.f32.mrf.mxu1 }
 0x150   :  { %982 = vst [vmem:[#allocation10 + $0x50] sm:$0xff] %v387_v24  ;;  %1031 = vst [vmem:[#allocation11 + $0x78] sm:$0xff] %v697_v25  ;;  %v389_v35 = vadd.f32 %v388_v30, %v1646_v28  ;;  %v699_v37 = vadd.f32 %v698_v32, %v1649_v34 }
 0x152   :  { %983 = vst [vmem:[#allocation10 + $0x58] sm:$0xff] %v389_v35  ;;  %1032 = vst [vmem:[#allocation11 + $0x80] sm:$0xff] %v699_v37 }
 0x153   :  { %v392_v38 = vpop.f32.mrf.mxu0  ;;  %v702_v40 = vpop.f32.mrf.mxu1 }
 0x154   :  { %v393_v46 = vadd.f32 %v392_v38, %v1641_v21  ;;  %v703_v47 = vadd.f32 %v702_v40, %v1644_v27 }
 0x155   :  { %v394_v48 = vpop.f32.mrf.mxu0  ;;  %v704_v50 = vpop.f32.mrf.mxu1 }
 0x156   :  { %984 = vst [vmem:[#allocation10 + $0x60] sm:$0xff] %v393_v46  ;;  %1034 = vst [vmem:[#allocation11 + $0x90] sm:$0xff] %v703_v47  ;;  %v395_v3 = vadd.f32 %v394_v48, %v1646_v28  ;;  %v705_v11 = vadd.f32 %v704_v50, %v1649_v34 }
 0x157   :  { %v398_v12 = vpop.f32.mrf.mxu0  ;;  %v708_v19 = vpop.f32.mrf.mxu1 }
 0x158   :  { %985 = vst [vmem:[#allocation10 + $0x68] sm:$0xff] %v395_v3  ;;  %1035 = vst [vmem:[#allocation11 + $0x98] sm:$0xff] %v705_v11  ;;  %v399_v36 = vadd.f32 %v398_v12, %v1641_v21  ;;  %v709_v42 = vadd.f32 %v708_v19, %v1644_v27 }
 0x159   :  { %v400_v43 = vpop.f32.mrf.mxu0  ;;  %v710_v49 = vpop.f32.mrf.mxu1 }
 0x15a   :  { %986 = vst [vmem:[#allocation10 + $0x70] sm:$0xff] %v399_v36  ;;  %1037 = vst [vmem:[#allocation11 + $0xa8] sm:$0xff] %v709_v42  ;;  %v401_v51 = vadd.f32 %v400_v43, %v1646_v28  ;;  %v711_v57 = vadd.f32 %v710_v49, %v1649_v34 }
 0x15c   :  { %987 = vst [vmem:[#allocation10 + $0x78] sm:$0xff] %v401_v51  ;;  %1038 = vst [vmem:[#allocation11 + $0xb0] sm:$0xff] %v711_v57  ;;  %v404_v58 = vpop.f32.mrf.mxu0  ;;  %v714_v0 = vpop.f32.mrf.mxu1 }
 0x15d   :  { %v405_v1 = vadd.f32 %v404_v58, %v1641_v21  ;;  %v715_v10 = vadd.f32 %v714_v0, %v1644_v27 }
 0x15e   :  { %v406_v14 = vpop.f32.mrf.mxu0  ;;  %v716_v22 = vpop.f32.mrf.mxu1 }
 0x15f   :  { %988 = vst [vmem:[#allocation10 + $0x80] sm:$0xff] %v405_v1  ;;  %1040 = vst [vmem:[#allocation11 + $0xc0] sm:$0xff] %v715_v10  ;;  %v407_v23 = vadd.f32 %v406_v14, %v1646_v28  ;;  %v717_v31 = vadd.f32 %v716_v22, %v1649_v34 }
 0x161   :  { %989 = vst [vmem:[#allocation10 + $0x88] sm:$0xff] %v407_v23  ;;  %1041 = vst [vmem:[#allocation11 + $0xc8] sm:$0xff] %v717_v31  ;;  %v410_v33 = vpop.f32.mrf.mxu0  ;;  %v720_v41 = vpop.f32.mrf.mxu1 }
 0x162   :  { %v411_v44 = vadd.f32 %v410_v33, %v1641_v21  ;;  %v721_v52 = vadd.f32 %v720_v41, %v1644_v27 }
 0x163   :  { %v412_v54 = vpop.f32.mrf.mxu0  ;;  %v722_v62 = vpop.f32.mrf.mxu1 }
 0x164   :  { %990 = vst [vmem:[#allocation10 + $0x90] sm:$0xff] %v411_v44  ;;  %1043 = vst [vmem:[#allocation11 + $0xd8] sm:$0xff] %v721_v52  ;;  %v413_v63 = vadd.f32 %v412_v54, %v1646_v28  ;;  %v723_v9 = vadd.f32 %v722_v62, %v1649_v34 }
 0x166   :  { %991 = vst [vmem:[#allocation10 + $0x98] sm:$0xff] %v413_v63  ;;  %1044 = vst [vmem:[#allocation11 + $0xe0] sm:$0xff] %v723_v9  ;;  %v416_v16 = vpop.f32.mrf.mxu0  ;;  %v726_v26 = vpop.f32.mrf.mxu1 }
 0x167   :  { %v417_v29 = vadd.f32 %v416_v16, %v1641_v21  ;;  %v727_v39 = vadd.f32 %v726_v26, %v1644_v27 }
 0x168   :  { %v418_v45 = vpop.f32.mrf.mxu0  ;;  %v728_v53 = vpop.f32.mrf.mxu1 }
 0x169   :  { %992 = vst [vmem:[#allocation10 + $0xa0] sm:$0xff] %v417_v29  ;;  %1046 = vst [vmem:[#allocation11 + $0xf0] sm:$0xff] %v727_v39  ;;  %v419_v55 = vadd.f32 %v418_v45, %v1646_v28  ;;  %v729_v56 = vadd.f32 %v728_v53, %v1649_v34 }
 0x16b   :  { %993 = vst [vmem:[#allocation10 + $0xa8] sm:$0xff] %v419_v55  ;;  %1047 = vst [vmem:[#allocation11 + $0xf8] sm:$0xff] %v729_v56  ;;  %v422_v59 = vpop.f32.mrf.mxu0  ;;  %v732_v60 = vpop.f32.mrf.mxu1 }
 0x16c   :  { %v423_v61 = vadd.f32 %v422_v59, %v1641_v21  ;;  %v733_v2 = vadd.f32 %v732_v60, %v1644_v27 }
 0x16d   :  { %v424_v4 = vpop.f32.mrf.mxu0  ;;  %v734_v6 = vpop.f32.mrf.mxu1 }
 0x16e   :  { %994 = vst [vmem:[#allocation10 + $0xb0] sm:$0xff] %v423_v61  ;;  %1049 = vst [vmem:[#allocation11 + $0x108] sm:$0xff] %v733_v2  ;;  %v425_v7 = vadd.f32 %v424_v4, %v1646_v28  ;;  %v735_v8 = vadd.f32 %v734_v6, %v1649_v34 }
 0x170   :  { %995 = vst [vmem:[#allocation10 + $0xb8] sm:$0xff] %v425_v7  ;;  %1050 = vst [vmem:[#allocation11 + $0x110] sm:$0xff] %v735_v8  ;;  %v428_v15 = vpop.f32.mrf.mxu0  ;;  %v738_v17 = vpop.f32.mrf.mxu1 }
 0x171   :  { %v429_v18 = vadd.f32 %v428_v15, %v1641_v21  ;;  %v739_v20 = vadd.f32 %v738_v17, %v1644_v27 }
 0x172   :  { %v430_v24 = vpop.f32.mrf.mxu0  ;;  %v740_v25 = vpop.f32.mrf.mxu1 }
 0x173   :  { %996 = vst [vmem:[#allocation10 + $0xc0] sm:$0xff] %v429_v18  ;;  %1052 = vst [vmem:[#allocation11 + $0x120] sm:$0xff] %v739_v20  ;;  %v431_v30 = vadd.f32 %v430_v24, %v1646_v28  ;;  %v741_v32 = vadd.f32 %v740_v25, %v1649_v34 }
 0x175   :  { %997 = vst [vmem:[#allocation10 + $0xc8] sm:$0xff] %v431_v30  ;;  %1053 = vst [vmem:[#allocation11 + $0x128] sm:$0xff] %v741_v32  ;;  %v434_v35 = vpop.f32.mrf.mxu0  ;;  %v744_v37 = vpop.f32.mrf.mxu1 }
 0x176   :  { %v435_v38 = vadd.f32 %v434_v35, %v1641_v21  ;;  %v745_v40 = vadd.f32 %v744_v37, %v1644_v27 }
 0x177   :  { %v436_v46 = vpop.f32.mrf.mxu0  ;;  %v746_v47 = vpop.f32.mrf.mxu1 }
 0x178   :  { %998 = vst [vmem:[#allocation10 + $0xd0] sm:$0xff] %v435_v38  ;;  %1055 = vst [vmem:[#allocation11 + $0x138] sm:$0xff] %v745_v40  ;;  %v437_v48 = vadd.f32 %v436_v46, %v1646_v28  ;;  %v747_v50 = vadd.f32 %v746_v47, %v1649_v34 }
 0x17a   :  { %999 = vst [vmem:[#allocation10 + $0xd8] sm:$0xff] %v437_v48  ;;  %1056 = vst [vmem:[#allocation11 + $0x140] sm:$0xff] %v747_v50  ;;  %v440_v3 = vpop.f32.mrf.mxu0  ;;  %v750_v11 = vpop.f32.mrf.mxu1  ;;  %v595_v48 = vsub.s32 2, %v1629_v5 }
 0x17b   :  { %v441_v12 = vadd.f32 %v440_v3, %v1641_v21  ;;  %v751_v19 = vadd.f32 %v750_v11, %v1644_v27 }
 0x17c   :  { %v442_v36 = vpop.f32.mrf.mxu0  ;;  %v752_v42 = vpop.f32.mrf.mxu1 }
 0x17d   :  { %1000 = vst [vmem:[#allocation10 + $0xe0] sm:$0xff] %v441_v12  ;;  %1058 = vst [vmem:[#allocation11 + $0x150] sm:$0xff] %v751_v19  ;;  %v443_v43 = vadd.f32 %v442_v36, %v1646_v28  ;;  %v753_v49 = vadd.f32 %v752_v42, %v1649_v34  ;;  %v1739_v42 = vrot.slane %v1638_v13, %v595_v48 }
 0x17f   :  { %1001 = vst [vmem:[#allocation10 + $0xe8] sm:$0xff] %v443_v43  ;;  %1059 = vst [vmem:[#allocation11 + $0x158] sm:$0xff] %v753_v49  ;;  %v446_v51 = vpop.f32.mrf.mxu0  ;;  %v756_v57 = vpop.f32.mrf.mxu1 }
 0x180   :  { %v447_v58 = vadd.f32 %v446_v51, %v1641_v21  ;;  %v757_v0 = vadd.f32 %v756_v57, %v1644_v27 }
 0x181   :  { %v448_v1 = vpop.f32.mrf.mxu0  ;;  %v758_v10 = vpop.f32.mrf.mxu1 }
 0x182   :  { %1002 = vst [vmem:[#allocation10 + $0xf0] sm:$0xff] %v447_v58  ;;  %1061 = vst [vmem:[#allocation11 + $0x168] sm:$0xff] %v757_v0  ;;  %v449_v14 = vadd.f32 %v448_v1, %v1646_v28  ;;  %v759_v22 = vadd.f32 %v758_v10, %v1649_v34 }
 0x183   :  { %v452_v23 = vpop.f32.mrf.mxu0  ;;  %v762_v31 = vpop.f32.mrf.mxu1 }
 0x184   :  { %1003 = vst [vmem:[#allocation10 + $0xf8] sm:$0xff] %v449_v14  ;;  %1062 = vst [vmem:[#allocation11 + $0x170] sm:$0xff] %v759_v22  ;;  %v453_v33 = vadd.f32 %v452_v23, %v1641_v21  ;;  %v763_v41 = vadd.f32 %v762_v31, %v1644_v27 }
 0x185   :  { %v454_v44 = vpop.f32.mrf.mxu0  ;;  %v764_v52 = vpop.f32.mrf.mxu1 }
 0x186   :  { %1004 = vst [vmem:[#allocation10 + $0x100] sm:$0xff] %v453_v33  ;;  %1064 = vst [vmem:[#allocation11 + $0x180] sm:$0xff] %v763_v41  ;;  %v455_v54 = vadd.f32 %v454_v44, %v1646_v28  ;;  %v765_v62 = vadd.f32 %v764_v52, %v1649_v34 }
 0x188   :  { %1005 = vst [vmem:[#allocation10 + $0x108] sm:$0xff] %v455_v54  ;;  %1065 = vst [vmem:[#allocation11 + $0x188] sm:$0xff] %v765_v62 }
 0x189   :  { %v458_v63 = vpop.f32.mrf.mxu0  ;;  %v768_v9 = vpop.f32.mrf.mxu1 }
 0x18a   :  { %v459_v16 = vadd.f32 %v458_v63, %v1641_v21  ;;  %v769_v26 = vadd.f32 %v768_v9, %v1644_v27 }
 0x18b   :  { %v460_v29 = vpop.f32.mrf.mxu0  ;;  %v770_v39 = vpop.f32.mrf.mxu1 }
 0x18c   :  { %1006 = vst [vmem:[#allocation10 + $0x110] sm:$0xff] %v459_v16  ;;  %1067 = vst [vmem:[#allocation11 + $0x198] sm:$0xff] %v769_v26  ;;  %v461_v45 = vadd.f32 %v460_v29, %v1646_v28  ;;  %v771_v53 = vadd.f32 %v770_v39, %v1649_v34 }
 0x18d   :  { %v464_v55 = vpop.f32.mrf.mxu0  ;;  %v774_v56 = vpop.f32.mrf.mxu1 }
 0x18e   :  { %1007 = vst [vmem:[#allocation10 + $0x118] sm:$0xff] %v461_v45  ;;  %1068 = vst [vmem:[#allocation11 + $0x1a0] sm:$0xff] %v771_v53  ;;  %v465_v59 = vadd.f32 %v464_v55, %v1641_v21  ;;  %v775_v60 = vadd.f32 %v774_v56, %v1644_v27 }
 0x18f   :  { %v466_v61 = vpop.f32.mrf.mxu0  ;;  %v776_v2 = vpop.f32.mrf.mxu1 }
 0x190   :  { %1008 = vst [vmem:[#allocation10 + $0x120] sm:$0xff] %v465_v59  ;;  %1070 = vst [vmem:[#allocation11 + $0x1b0] sm:$0xff] %v775_v60  ;;  %v467_v4 = vadd.f32 %v466_v61, %v1646_v28  ;;  %v777_v6 = vadd.f32 %v776_v2, %v1649_v34 }
 0x192   :  { %1009 = vst [vmem:[#allocation10 + $0x128] sm:$0xff] %v467_v4  ;;  %1071 = vst [vmem:[#allocation11 + $0x1b8] sm:$0xff] %v777_v6  ;;  %v470_v7 = vpop.f32.mrf.mxu0  ;;  %v780_v8 = vpop.f32.mrf.mxu1 }
 0x193   :  { %v471_v15 = vadd.f32 %v470_v7, %v1641_v21  ;;  %v781_v17 = vadd.f32 %v780_v8, %v1644_v27 }
 0x194   :  { %v472_v18 = vpop.f32.mrf.mxu0  ;;  %v782_v20 = vpop.f32.mrf.mxu1 }
 0x195   :  { %1010 = vst [vmem:[#allocation10 + $0x130] sm:$0xff] %v471_v15  ;;  %1073 = vst [vmem:[#allocation11 + $0x1c8] sm:$0xff] %v781_v17  ;;  %v473_v24 = vadd.f32 %v472_v18, %v1646_v28  ;;  %v783_v25 = vadd.f32 %v782_v20, %v1649_v34 }
 0x197   :  { %1011 = vst [vmem:[#allocation10 + $0x138] sm:$0xff] %v473_v24  ;;  %1074 = vst [vmem:[#allocation11 + $0x1d0] sm:$0xff] %v783_v25  ;;  %v476_v30 = vpop.f32.mrf.mxu0  ;;  %v786_v32 = vpop.f32.mrf.mxu1 }
 0x198   :  { %v477_v35 = vadd.f32 %v476_v30, %v1641_v21  ;;  %v787_v37 = vadd.f32 %v786_v32, %v1644_v27 }
 0x199   :  { %v478_v38 = vpop.f32.mrf.mxu0  ;;  %v788_v40 = vpop.f32.mrf.mxu1 }
 0x19a   :  { %1012 = vst [vmem:[#allocation10 + $0x140] sm:$0xff] %v477_v35  ;;  %1076 = vst [vmem:[#allocation11 + $0x1e0] sm:$0xff] %v787_v37  ;;  %v479_v46 = vadd.f32 %v478_v38, %v1646_v28  ;;  %v789_v47 = vadd.f32 %v788_v40, %v1649_v34 }
 0x19c   :  { %1013 = vst [vmem:[#allocation10 + $0x148] sm:$0xff] %v479_v46  ;;  %1077 = vst [vmem:[#allocation11 + $0x1e8] sm:$0xff] %v789_v47  ;;  %v482_v50 = vpop.f32.mrf.mxu0  ;;  %v792_v3 = vpop.f32.mrf.mxu1 }
 0x19d   :  { %v483_v11 = vadd.f32 %v482_v50, %v1641_v21  ;;  %v793_v12 = vadd.f32 %v792_v3, %v1644_v27 }
 0x19e   :  { %v484_v19 = vpop.f32.mrf.mxu0  ;;  %v794_v36 = vpop.f32.mrf.mxu1 }
 0x19f   :  { %1014 = vst [vmem:[#allocation10 + $0x150] sm:$0xff] %v483_v11  ;;  %1079 = vst [vmem:[#allocation11 + $0x1f8] sm:$0xff] %v793_v12  ;;  %v485_v43 = vadd.f32 %v484_v19, %v1646_v28  ;;  %v795_v5 = vadd.f32 %v794_v36, %v1649_v34 }
 0x1a1   :  { %1015 = vst [vmem:[#allocation10 + $0x158] sm:$0xff] %v485_v43  ;;  %1080 = vst [vmem:[#allocation11 + $0x200] sm:$0xff] %v795_v5  ;;  %v863_v49 = vpop.f32.mrf.mxu0  ;;  %v918_v51 = vpop.f32.mrf.mxu1 }
 0x1a2   :  { %v864_v21 = vadd.f32 %v863_v49, %v1739_v42  ;;  %v919_v27 = vadd.f32 %v918_v51, %v1739_v42 }
 0x1a3   :  { %1283 = shalt.err (!%p1280_p10)
}
 0x1a4   :  { %1093 = dma.vmem_to_hbm [thread:$0]  %s1088_s5, 5632, %s1783_s6, [#allocation4], %s1324_s29, %s1324_s29, %s1325_s30   ;;  %v865_v13 = vpop.f32.mrf.mxu0  ;;  %v920_v28 = vpop.f32.mrf.mxu1  ;;  %1018 = vst [vmem:[#allocation11 + $0x10] sm:$0xff] %v864_v21  ;;  %1051 = vst [vmem:[#allocation11 + $0x118] sm:$0xff] %v919_v27 }
 0x1a5   :  { %s1332_s6 = smov [#allocation11]  }
 0x1a6   :  { %v868_v34 = vpop.f32.mrf.mxu0  ;;  %v923_v57 = vpop.f32.mrf.mxu1  ;;  %s1099_s28 = sshll.u32 %s1332_s6, 4  ;;  %s1100_s28 = int_to_ptr.vmem [resolvable:$true] %s1099_s28 }
 0x1a7   :  { %v869_v58 = vadd.f32 %v868_v34, %v1739_v42  ;;  %v924_v0 = vadd.f32 %v923_v57, %v1739_v42  ;;  %s1292_s29 = scalar_lea.vmem %s1100_s28, 8448  ;;  %p1297_p12 = scmp.lt.s32.totalorder %s1100_s28, %s1100_s28 }
 0x1a8   :  { %v870_v1 = vpop.f32.mrf.mxu0  ;;  %v925_v10 = vpop.f32.mrf.mxu1  ;;  %p1293_p11 = scmp.ne.s32.totalorder %s1100_s28, %s1292_s29  ;;  %p1298_p13 = scmp.lt.s32.totalorder %s1292_s29, %s1292_s29 }
 0x1a9   :  { %1021 = vst [vmem:[#allocation11 + $0x28] sm:$0xff] %v869_v58  ;;  %1054 = vst [vmem:[#allocation11 + $0x130] sm:$0xff] %v924_v0 }
 0x1aa   :  { %v873_v14 = vpop.f32.mrf.mxu0  ;;  %v928_v22 = vpop.f32.mrf.mxu1  ;;  %p1299_p0 = por %p1298_p13, %p1297_p12 }
 0x1ab   :  { %v874_v23 = vadd.f32 %v873_v14, %v1739_v42  ;;  %v929_v31 = vadd.f32 %v928_v22, %v1739_v42 }
 0x1ac   :  { %v875_v33 = vpop.f32.mrf.mxu0  ;;  %v930_v41 = vpop.f32.mrf.mxu1  ;;  %p1300_p1 = pnand %p1299_p0, %p1293_p11 }
 0x1ad   :  { %1024 = vst [vmem:[#allocation11 + $0x40] sm:$0xff] %v874_v23  ;;  %1057 = vst [vmem:[#allocation11 + $0x148] sm:$0xff] %v929_v31 }
 0x1ae   :  { %v878_v44 = vpop.f32.mrf.mxu0  ;;  %v933_v52 = vpop.f32.mrf.mxu1 }
 0x1af   :  { %v879_v54 = vadd.f32 %v878_v44, %v1739_v42  ;;  %v934_v62 = vadd.f32 %v933_v52, %v1739_v42 }
 0x1b0   :  { %v880_v63 = vpop.f32.mrf.mxu0  ;;  %v935_v9 = vpop.f32.mrf.mxu1 }
 0x1b1   :  { %1027 = vst [vmem:[#allocation11 + $0x58] sm:$0xff] %v879_v54  ;;  %1060 = vst [vmem:[#allocation11 + $0x160] sm:$0xff] %v934_v62 }
 0x1b2   :  { %v883_v16 = vpop.f32.mrf.mxu0  ;;  %v938_v26 = vpop.f32.mrf.mxu1 }
 0x1b3   :  { %v884_v29 = vadd.f32 %v883_v16, %v1739_v42  ;;  %v939_v39 = vadd.f32 %v938_v26, %v1739_v42 }
 0x1b4   :  { %v885_v45 = vpop.f32.mrf.mxu0  ;;  %v940_v53 = vpop.f32.mrf.mxu1 }
 0x1b5   :  { %1030 = vst [vmem:[#allocation11 + $0x70] sm:$0xff] %v884_v29  ;;  %1063 = vst [vmem:[#allocation11 + $0x178] sm:$0xff] %v939_v39 }
 0x1b6   :  { %v888_v55 = vpop.f32.mrf.mxu0  ;;  %v943_v56 = vpop.f32.mrf.mxu1 }
 0x1b7   :  { %v889_v59 = vadd.f32 %v888_v55, %v1739_v42  ;;  %v944_v60 = vadd.f32 %v943_v56, %v1739_v42 }
 0x1b8   :  { %v890_v61 = vpop.f32.mrf.mxu0  ;;  %v945_v2 = vpop.f32.mrf.mxu1 }
 0x1b9   :  { %1033 = vst [vmem:[#allocation11 + $0x88] sm:$0xff] %v889_v59  ;;  %1066 = vst [vmem:[#allocation11 + $0x190] sm:$0xff] %v944_v60 }
 0x1ba   :  { %v893_v4 = vpop.f32.mrf.mxu0  ;;  %v948_v6 = vpop.f32.mrf.mxu1 }
 0x1bb   :  { %v894_v7 = vadd.f32 %v893_v4, %v1739_v42  ;;  %v949_v8 = vadd.f32 %v948_v6, %v1739_v42 }
 0x1bc   :  { %v895_v15 = vpop.f32.mrf.mxu0  ;;  %v950_v17 = vpop.f32.mrf.mxu1 }
 0x1bd   :  { %1036 = vst [vmem:[#allocation11 + $0xa0] sm:$0xff] %v894_v7  ;;  %1069 = vst [vmem:[#allocation11 + $0x1a8] sm:$0xff] %v949_v8 }
 0x1be   :  { %v898_v18 = vpop.f32.mrf.mxu0  ;;  %v953_v20 = vpop.f32.mrf.mxu1 }
 0x1bf   :  { %v899_v24 = vadd.f32 %v898_v18, %v1739_v42  ;;  %v954_v25 = vadd.f32 %v953_v20, %v1739_v42 }
 0x1c0   :  { %v900_v30 = vpop.f32.mrf.mxu0  ;;  %v955_v32 = vpop.f32.mrf.mxu1 }
 0x1c1   :  { %1039 = vst [vmem:[#allocation11 + $0xb8] sm:$0xff] %v899_v24  ;;  %1072 = vst [vmem:[#allocation11 + $0x1c0] sm:$0xff] %v954_v25 }
 0x1c2   :  { %v903_v35 = vpop.f32.mrf.mxu0  ;;  %v958_v37 = vpop.f32.mrf.mxu1 }
 0x1c3   :  { %v904_v38 = vadd.f32 %v903_v35, %v1739_v42  ;;  %v959_v40 = vadd.f32 %v958_v37, %v1739_v42 }
 0x1c4   :  { %v905_v46 = vpop.f32.mrf.mxu0  ;;  %v960_v47 = vpop.f32.mrf.mxu1 }
 0x1c5   :  { %1042 = vst [vmem:[#allocation11 + $0xd0] sm:$0xff] %v904_v38  ;;  %1075 = vst [vmem:[#allocation11 + $0x1d8] sm:$0xff] %v959_v40 }
 0x1c6   :  { %v908_v48 = vpop.f32.mrf.mxu0  ;;  %v963_v50 = vpop.f32.mrf.mxu1 }
 0x1c7   :  { %v909_v3 = vadd.f32 %v908_v48, %v1739_v42  ;;  %v964_v11 = vadd.f32 %v963_v50, %v1739_v42 }
 0x1c8   :  { %v910_v12 = vpop.f32.mrf.mxu0  ;;  %v965_v19 = vpop.f32.mrf.mxu1 }
 0x1c9   :  { %1045 = vst [vmem:[#allocation11 + $0xe8] sm:$0xff] %v909_v3  ;;  %1078 = vst [vmem:[#allocation11 + $0x1f0] sm:$0xff] %v964_v11 }
 0x1ca   :  { %v913_v36 = vpop.f32.mrf.mxu0  ;;  %v968_v43 = vpop.f32.mrf.mxu1 }
 0x1cb   :  { %v914_v5 = vadd.f32 %v913_v36, %v1739_v42  ;;  %v969_v49 = vadd.f32 %v968_v43, %v1739_v42 }
 0x1cc   :  { %v915_v51 = vpop.f32.mrf.mxu0  ;;  %v970_v21 = vpop.f32.mrf.mxu1 }
 0x1cd   :  { %1048 = vst [vmem:[#allocation11 + $0x100] sm:$0xff] %v914_v5  ;;  %1081 = vst [vmem:[#allocation11 + $0x208] sm:$0xff] %v969_v49 }
 0x1ce   :  { %1303 = shalt.err (!%p1300_p1)
}
 0x1cf   :  { %1105 = dma.vmem_to_hbm [thread:$0]  %s1100_s28, 8448, %s1784_s7, [#allocation12], %s1328_s19, %s1328_s19, %s1329_s20  }
 0x1d0   :  { %1318 = dma.done.wait [#allocation4], 5632  }
 0x1d1   :  { %1319 = vsyncadd [#allocation4], 4294961664 }
 0x1d2   :  { %1320 = dma.done.wait [#allocation12], 8448  }
 0x1d3   :  { %1321 = vsyncadd [#allocation12], 4294958848 }
 0x1d4   :  { %1112 = vsyncpa [#allocation3], 1 }
 0x1d5   :  { %1113 = vsyncpa [#allocation6], 1 }
 0x1d6   :  { %1114 = vsyncpa [#allocation9], 1 }
 0x1d7   :  { %1115 = vsyncpa [#allocation4], 1 }
 0x1d8   :  { %1116 = vsyncpa [#allocation12], 1 }

</bundles_post_ra>
